<compile_context>
chip_gen: v6e
topology: v6e:2x2x1
jax: 0.10.0
libtpu: 0.0.40
codegen_flags: <defaults>
</compile_context>

<pallas_src>
import math
import jax
import jax.numpy as jnp
from jax.experimental import pallas as pl
from jax.experimental.pallas import tpu as pltpu


def _layer_norm(y, g, b):
    m = jnp.mean(y, axis=-1, keepdims=True)
    v = jnp.mean((y - m) ** 2, axis=-1, keepdims=True)
    return (y - m) * jax.lax.rsqrt(v + 1e-5) * g + b


def transformer_block_kernel(
    x_ref,                     # (1, T, E)   full sequence for batch b, f32
    wq_ref,                    # (E, H*E)    bf16, 1/sqrt(E) pre-folded
    wkv_ref,                   # (E, 2*H*E)  bf16, [wk | wv]
    wu_ref, bu_ref,            # (H*E, E) bf16, (1, E) f32
    g1_ref, b1_ref,            # (1, E) f32
    wf1_ref, bf1_ref,          # (E, FF) bf16, (1, FF) f32
    wf2_ref, bf2_ref,          # (FF, E) bf16, (1, E) f32
    g2_ref, b2_ref,            # (1, E) f32
    out_ref,                   # (1, TQ, E)  f32
    kv_ref,                    # VMEM scratch (T, 2*H*E) bf16 — K/V, persistent across query tiles
    heads_ref,                 # VMEM scratch (TQ, H*E) bf16 — per-head outputs
):
    qi = pl.program_id(1)
    TQ, E = out_ref.shape[1], out_ref.shape[2]
    HE = wq_ref.shape[1]
    H = HE // E

    # ----- K/V projection: once per batch element (qi == 0), reused for all query tiles -----
    @pl.when(qi == 0)
    def _():
        xs_bf = x_ref[0].astype(jnp.bfloat16)                       # (T, E)
        kv = jnp.dot(xs_bf, wkv_ref[...],
                     preferred_element_type=jnp.float32)             # (T, 2*H*E) f32 accum
        kv_ref[...] = kv.astype(jnp.bfloat16)                        # stored bf16

    # ----- query-row tile: slice of the already-resident x block (no duplicate input) -----
    row0 = pl.multiple_of(qi * TQ, TQ)
    xq = x_ref[0, pl.ds(row0, TQ), :]                               # (TQ, E) f32
    xq_bf = xq.astype(jnp.bfloat16)

    # scale 1/sqrt(E) already folded into wq host-side
    q_all = jnp.dot(xq_bf, wq_ref[...],
                    preferred_element_type=jnp.float32)              # (TQ, H*E)

    # ----- per-head attention; heads written to lane-offset slots of heads_ref -----
    for h in range(H):                                               # H small & static
        lo, hi = h * E, (h + 1) * E
        q = q_all[:, lo:hi].astype(jnp.bfloat16)                     # (TQ, E)
        k = kv_ref[:, lo:hi]                                         # (T, E) bf16
        v = kv_ref[:, HE + lo:HE + hi]                               # (T, E) bf16

        # scores = q @ k^T via transposed-RHS contraction (no explicit transpose)
        s = jax.lax.dot_general(
            q, k,
            dimension_numbers=(((1,), (1,)), ((), ())),
            preferred_element_type=jnp.float32)                      # (TQ, T) f32

        s = s - jnp.max(s, axis=-1, keepdims=True)
        p = jnp.exp(s)                                               # unnormalized, values <= 1
        denom = jnp.sum(p, axis=-1, keepdims=True)                   # (TQ, 1)

        head = jnp.dot(p.astype(jnp.bfloat16), v,
                       preferred_element_type=jnp.float32)           # (TQ, E)
        head = head * pl.reciprocal(denom, approx=True)              # normalize after PV
        heads_ref[:, lo:hi] = head.astype(jnp.bfloat16)

    # ----- unifyheads: single K = H*E contraction (full MXU depth on v6e/v7x) -----
    attended = jnp.dot(heads_ref[...], wu_ref[...],
                       preferred_element_type=jnp.float32) + bu_ref[0]

    # ----- residual + LayerNorm1 (f32); dropout(p=0) is identity -----
    y = _layer_norm(attended + xq, g1_ref[0], b1_ref[0])

    # ----- feed-forward (bf16 MXU operands, f32 accumulation) -----
    h1 = jnp.dot(y.astype(jnp.bfloat16), wf1_ref[...],
                 preferred_element_type=jnp.float32) + bf1_ref[0]
    h1 = jnp.maximum(h1, 0.0)
    ff = jnp.dot(h1.astype(jnp.bfloat16), wf2_ref[...],
                 preferred_element_type=jnp.float32) + bf2_ref[0]

    # ----- residual + LayerNorm2 (f32) -----
    out_ref[0] = _layer_norm(ff + y, g2_ref[0], b2_ref[0])


def _vmem_limit_bytes():
    """Generation-aware VMEM limit: ~75% of physical per-core VMEM (v7x 64MiB->48, v5e/v6e 128->96)."""
    try:
        cap = pltpu.get_tpu_info().vmem_capacity_bytes
        return int(cap * 3 // 4)
    except Exception:
        return 48 * 1024 * 1024


def _pick_tq(B, T):
    TQ = T
    for cand in (256, 128, 64):
        if T % cand == 0:
            TQ = cand
            break
    # Guarantee >= 2 grid steps so both v7x TensorCores get work (v5e/v6e: no-op).
    if B * (T // TQ) < 2:
        for cand in (128, 64):
            if cand < TQ and T % cand == 0:
                TQ = cand
                break
    # TODO(synk): pad/mask the score tile for T not a multiple of 64 instead of the TQ=T fallback.
    return TQ


def prepare_kernel_params(params):
    """One-time host-side weight prep: bf16 cast, wk|wv fusion, 1/sqrt(E) folded into wq.
    Call ONCE and reuse across invocations (per-call casting would re-pay the HBM traffic)."""
    E = params["wq"].shape[0]
    scale = 1.0 / math.sqrt(E)
    bf = lambda a: a.astype(jnp.bfloat16)
    return {
        "wq":  bf(params["wq"] * scale),
        "wkv": bf(jnp.concatenate([params["wk"], params["wv"]], axis=1)),
        "wu":  bf(params["wu"]),  "bu":  params["bu"],
        "g1":  params["g1"],      "b1":  params["b1"],
        "wf1": bf(params["wf1"]), "bf1": params["bf1"],
        "wf2": bf(params["wf2"]), "bf2": params["bf2"],
        "g2":  params["g2"],      "b2":  params["b2"],
    }


def transformer_block(x, kp):
    B, T, E = x.shape
    HE = kp["wq"].shape[1]        # H * E
    HE2 = kp["wkv"].shape[1]      # 2 * H * E
    FF = kp["wf1"].shape[1]

    TQ = _pick_tq(B, T)
    NQ = T // TQ

    # Weight block indices never change across the grid; Pallas skips re-DMA for
    # constant block indices, so they stay resident in VMEM.
    const = lambda shape: pl.BlockSpec(shape, lambda b, qi: (0, 0))

    in_specs = [
        # Single x input: full-sequence block per batch element, resident across qi.
        pl.BlockSpec((1, T, E), lambda b, qi: (b, 0, 0)),
        const((E, HE)),    # wq (pre-scaled)
        const((E, HE2)),   # wkv = [wk | wv]
        const((HE, E)),    # wu
        const((1, E)),     # bu
        const((1, E)),     # gamma1
        const((1, E)),     # beta1
        const((E, FF)),    # wf1
        const((1, FF)),    # bf1
        const((FF, E)),    # wf2
        const((1, E)),     # bf2
        const((1, E)),     # gamma2
        const((1, E)),     # beta2
    ]

    return pl.pallas_call(
        transformer_block_kernel,
        out_shape=jax.ShapeDtypeStruct((B, T, E), jnp.float32),
        grid=(B, NQ),
        in_specs=in_specs,
        out_specs=pl.BlockSpec((1, TQ, E), lambda b, qi: (b, qi, 0)),
        scratch_shapes=[
            pltpu.VMEM((T, HE2), jnp.bfloat16),   # K/V, persistent across query tiles
            pltpu.VMEM((TQ, HE), jnp.bfloat16),   # per-head outputs feeding the fused unifyheads matmul
        ],
        compiler_params=pltpu.CompilerParams(
            # qi carries the K/V scratch -> "arbitrary"; batch elements are independent -> "parallel".
            dimension_semantics=("parallel", "arbitrary"),
            vmem_limit_bytes=_vmem_limit_bytes(),
        ),
    )(
        x,
        kp["wq"], kp["wkv"],
        kp["wu"], kp["bu"],
        kp["g1"], kp["b1"],
        kp["wf1"], kp["bf1"],
        kp["wf2"], kp["bf2"],
        kp["g2"], kp["b2"],
    )


def reference_block(x, params):
    """Pure-JAX f32 reference (mirrors the PyTorch forward)."""
    B, T, E = x.shape
    H = params["wq"].shape[1] // E
    scale = 1.0 / math.sqrt(E)

    def proj(w):  # (B, T, H*E) -> (B, H, T, E)
        y = x @ w
        return y.reshape(B, T, H, E).transpose(0, 2, 1, 3)

    q, k, v = proj(params["wq"]), proj(params["wk"]), proj(params["wv"])
    dot = jnp.einsum("bhte,bhse->bhts", q, k) * scale
    p = jax.nn.softmax(dot, axis=-1)
    out = jnp.einsum("bhts,bhse->bhte", p, v)
    out = out.transpose(0, 2, 1, 3).reshape(B, T, H * E)
    attended = out @ params["wu"] + params["bu"][0]

    def ln(y, g, b):
        m = jnp.mean(y, axis=-1, keepdims=True)
        vv = jnp.mean((y - m) ** 2, axis=-1, keepdims=True)
        return (y - m) * jax.lax.rsqrt(vv + 1e-5) * g[0] + b[0]

    y = ln(attended + x, params["g1"], params["b1"])
    ff = jnp.maximum(y @ params["wf1"] + params["bf1"][0], 0.0) @ params["wf2"] + params["bf2"][0]
    return ln(ff + y, params["g2"], params["b2"])


def init_params(key, emb, heads, ff_hidden_mult=4):
    ks = jax.random.split(key, 8)
    s = 0.05
    ff = ff_hidden_mult * emb
    return {
        "wq":  jax.random.normal(ks[0], (emb, emb * heads), jnp.float32) * s,
        "wk":  jax.random.normal(ks[1], (emb, emb * heads), jnp.float32) * s,
        "wv":  jax.random.normal(ks[2], (emb, emb * heads), jnp.float32) * s,
        "wu":  jax.random.normal(ks[3], (heads * emb, emb), jnp.float32) * s,
        "bu":  jax.random.normal(ks[4], (1, emb), jnp.float32) * s,
        "g1":  jnp.ones((1, emb), jnp.float32),
        "b1":  jnp.zeros((1, emb), jnp.float32),
        "wf1": jax.random.normal(ks[5], (emb, ff), jnp.float32) * s,
        "bf1": jax.random.normal(ks[6], (1, ff), jnp.float32) * s,
        "wf2": jax.random.normal(ks[7], (ff, emb), jnp.float32) * s,
        "bf2": jnp.zeros((1, emb), jnp.float32),
        "g2":  jnp.ones((1, emb), jnp.float32),
        "b2":  jnp.zeros((1, emb), jnp.float32),
    }


if __name__ == "__main__":
    # Lane-dense small config: E multiple of 128, T multiple of 8.
    B, T, EMB, HEADS = 2, 32, 128, 4
    key = jax.random.PRNGKey(0)
    kx, kp = jax.random.split(key)
    x = jax.random.normal(kx, (B, T, EMB), jnp.float32)
    params = init_params(kp, EMB, HEADS)
    kernel_params = prepare_kernel_params(params)   # one-time bf16 / fusion / scale-fold prep

    out = jax.block_until_ready(transformer_block(x, kernel_params))
    ref = reference_block(x, params)

    assert out.shape == (B, T, EMB)
    # bf16 MXU operands + approx reciprocal => relaxed tolerance vs. f32 reference (intentional).
    assert jnp.allclose(out, ref, atol=5e-2, rtol=5e-2), "mismatch vs pure-JAX reference"
    print("KERNEL_OK")
</pallas_src>

<mosaic_0001>
module attributes {stable_mosaic.version = 11 : i64} {
  func.func @transformer_block_kernel(%arg0: i32, %arg1: i32, %arg2: memref<1x32x128xf32, #tpu.memory_space<vmem>>, %arg3: memref<128x512xbf16, #tpu.memory_space<vmem>>, %arg4: memref<128x1024xbf16, #tpu.memory_space<vmem>>, %arg5: memref<512x128xbf16, #tpu.memory_space<vmem>>, %arg6: memref<1x128xf32, #tpu.memory_space<vmem>>, %arg7: memref<1x128xf32, #tpu.memory_space<vmem>>, %arg8: memref<1x128xf32, #tpu.memory_space<vmem>>, %arg9: memref<128x512xbf16, #tpu.memory_space<vmem>>, %arg10: memref<1x512xf32, #tpu.memory_space<vmem>>, %arg11: memref<512x128xbf16, #tpu.memory_space<vmem>>, %arg12: memref<1x128xf32, #tpu.memory_space<vmem>>, %arg13: memref<1x128xf32, #tpu.memory_space<vmem>>, %arg14: memref<1x128xf32, #tpu.memory_space<vmem>>, %arg15: memref<1x32x128xf32, #tpu.memory_space<vmem>>, %arg16: memref<32x1024xbf16, #tpu.memory_space<vmem>>, %arg17: memref<32x512xbf16, #tpu.memory_space<vmem>>) attributes {dimension_semantics = [#tpu.dimension_semantics<parallel>, #tpu.dimension_semantics<arbitrary>], iteration_bounds = array<i64: 2, 1>, scalar_prefetch = 0 : i64, scratch_operands = 2 : i64, tpu.core_type = #tpu.core_type<tc>, window_params = [{transform_indices = @transform_0, window_bounds = array<i64: 1, 32, 128>}, {pipeline_mode = #tpu.pipeline_mode<synchronous>, transform_indices = @transform_1, window_bounds = array<i64: 128, 512>}, {pipeline_mode = #tpu.pipeline_mode<synchronous>, transform_indices = @transform_2, window_bounds = array<i64: 128, 1024>}, {pipeline_mode = #tpu.pipeline_mode<synchronous>, transform_indices = @transform_3, window_bounds = array<i64: 512, 128>}, {pipeline_mode = #tpu.pipeline_mode<synchronous>, transform_indices = @transform_4, window_bounds = array<i64: 1, 128>}, {pipeline_mode = #tpu.pipeline_mode<synchronous>, transform_indices = @transform_5, window_bounds = array<i64: 1, 128>}, {pipeline_mode = #tpu.pipeline_mode<synchronous>, transform_indices = @transform_6, window_bounds = array<i64: 1, 128>}, {pipeline_mode = #tpu.pipeline_mode<synchronous>, transform_indices = @transform_7, window_bounds = array<i64: 128, 512>}, {pipeline_mode = #tpu.pipeline_mode<synchronous>, transform_indices = @transform_8, window_bounds = array<i64: 1, 512>}, {pipeline_mode = #tpu.pipeline_mode<synchronous>, transform_indices = @transform_9, window_bounds = array<i64: 512, 128>}, {pipeline_mode = #tpu.pipeline_mode<synchronous>, transform_indices = @transform_10, window_bounds = array<i64: 1, 128>}, {pipeline_mode = #tpu.pipeline_mode<synchronous>, transform_indices = @transform_11, window_bounds = array<i64: 1, 128>}, {pipeline_mode = #tpu.pipeline_mode<synchronous>, transform_indices = @transform_12, window_bounds = array<i64: 1, 128>}, {transform_indices = @transform_13, window_bounds = array<i64: 1, 32, 128>}]} {
    %c0_i32 = arith.constant 0 : i32
    %0 = arith.cmpi eq, %arg1, %c0_i32 : i32
    %1 = arith.extui %0 : i1 to i32
    %c0_i32_0 = arith.constant 0 : i32
    %2 = arith.cmpi ne, %1, %c0_i32_0 : i32
    scf.if %2 {
      %c0_76 = arith.constant 0 : index
      %c0_77 = arith.constant 0 : index
      %c0_78 = arith.constant 0 : index
      %174 = vector.load %arg2[%c0_76, %c0_77, %c0_78] : memref<1x32x128xf32, #tpu.memory_space<vmem>>, vector<1x32x128xf32>
      %175 = vector.shape_cast %174 : vector<1x32x128xf32> to vector<32x128xf32>
      %176 = arith.truncf %175 : vector<32x128xf32> to vector<32x128xbf16>
      %c0_79 = arith.constant 0 : index
      %c0_80 = arith.constant 0 : index
      %177 = vector.load %arg4[%c0_79, %c0_80] : memref<128x1024xbf16, #tpu.memory_space<vmem>>, vector<128x1024xbf16>
      %cst_81 = arith.constant dense<0.000000e+00> : vector<32x1024xf32>
      %178 = tpu.matmul %176, %177, %cst_81 {dimension_numbers = #tpu.dot_dimension_numbers<[1], [0], [0], [1], [0, 0, 1, 1], [], []>} : vector<32x128xbf16>, vector<128x1024xbf16>, vector<32x1024xf32> -> vector<32x1024xf32>
      %179 = arith.truncf %178 : vector<32x1024xf32> to vector<32x1024xbf16>
      %c0_82 = arith.constant 0 : index
      %c0_83 = arith.constant 0 : index
      %180 = vector.load %arg16[%c0_82, %c0_83] : memref<32x1024xbf16, #tpu.memory_space<vmem>>, vector<32x1024xbf16>
      tpu.vector_store %arg16[%c0_82, %c0_83], %179 {strides = array<i32>} : memref<32x1024xbf16, #tpu.memory_space<vmem>>, vector<32x1024xbf16>,
    } else {
    }
    %c32_i32 = arith.constant 32 : i32
    %3 = arith.muli %arg1, %c32_i32 : i32
    %4 = tpu.assume_multiple %3, 32 : i32
    %c0 = arith.constant 0 : index
    %5 = arith.index_cast %4 : i32 to index
    %c0_1 = arith.constant 0 : index
    %6 = vector.load %arg2[%c0, %5, %c0_1] : memref<1x32x128xf32, #tpu.memory_space<vmem>>, vector<1x32x128xf32>
    %7 = vector.shape_cast %6 : vector<1x32x128xf32> to vector<32x128xf32>
    %8 = arith.truncf %7 : vector<32x128xf32> to vector<32x128xbf16>
    %c0_2 = arith.constant 0 : index
    %c0_3 = arith.constant 0 : index
    %9 = vector.load %arg3[%c0_2, %c0_3] : memref<128x512xbf16, #tpu.memory_space<vmem>>, vector<128x512xbf16>
    %cst = arith.constant dense<0.000000e+00> : vector<32x512xf32>
    %10 = tpu.matmul %8, %9, %cst {dimension_numbers = #tpu.dot_dimension_numbers<[1], [0], [0], [1], [0, 0, 1, 1], [], []>} : vector<32x128xbf16>, vector<128x512xbf16>, vector<32x512xf32> -> vector<32x512xf32>
    %11 = vector.extract_strided_slice %10 {offsets = [0, 0], sizes = [32, 128], strides = [1, 1]} : vector<32x512xf32> to vector<32x128xf32>
    %12 = arith.truncf %11 : vector<32x128xf32> to vector<32x128xbf16>
    %c0_4 = arith.constant 0 : index
    %c0_5 = arith.constant 0 : index
    %13 = vector.load %arg16[%c0_4, %c0_5] : memref<32x1024xbf16, #tpu.memory_space<vmem>>, vector<32x128xbf16>
    %c0_6 = arith.constant 0 : index
    %c512 = arith.constant 512 : index
    %14 = vector.load %arg16[%c0_6, %c512] : memref<32x1024xbf16, #tpu.memory_space<vmem>>, vector<32x128xbf16>
    %cst_7 = arith.constant dense<0.000000e+00> : vector<32x32xf32>
    %15 = tpu.matmul %12, %13, %cst_7 {dimension_numbers = #tpu.dot_dimension_numbers<[1], [1], [0], [0], [0, 0, 1, 0], [], []>} : vector<32x128xbf16>, vector<32x128xbf16>, vector<32x32xf32> -> vector<32x32xf32>
    %cst_8 = arith.constant dense<0xFF800000> : vector<32xf32>
    %16 = vector.multi_reduction <maximumf>, %15, %cst_8 [1] : vector<32x32xf32> to vector<32xf32>
    %17 = vector.shape_cast %16 : vector<32xf32> to vector<32x1xf32>
    %18 = vector.broadcast %17 : vector<32x1xf32> to vector<32x32xf32>
    %19 = arith.subf %15, %18 : vector<32x32xf32>
    %20 = math.exp %19 : vector<32x32xf32>
    %cst_9 = arith.constant dense<0.000000e+00> : vector<32xf32>
    %21 = vector.multi_reduction <add>, %20, %cst_9 [1] : vector<32x32xf32> to vector<32xf32>
    %22 = vector.shape_cast %21 : vector<32xf32> to vector<32x1xf32>
    %23 = arith.truncf %20 : vector<32x32xf32> to vector<32x32xbf16>
    %cst_10 = arith.constant dense<0.000000e+00> : vector<32x128xf32>
    %24 = tpu.matmul %23, %14, %cst_10 {dimension_numbers = #tpu.dot_dimension_numbers<[1], [0], [0], [1], [0, 0, 1, 1], [], []>} : vector<32x32xbf16>, vector<32x128xbf16>, vector<32x128xf32> -> vector<32x128xf32>
    %25 = tpu.reciprocal %22 {approx = true} : vector<32x1xf32> -> vector<32x1xf32>
    %26 = vector.broadcast %25 : vector<32x1xf32> to vector<32x128xf32>
    %27 = arith.mulf %24, %26 : vector<32x128xf32>
    %28 = arith.truncf %27 : vector<32x128xf32> to vector<32x128xbf16>
    %c0_11 = arith.constant 0 : index
    %c0_12 = arith.constant 0 : index
    %29 = vector.load %arg17[%c0_11, %c0_12] : memref<32x512xbf16, #tpu.memory_space<vmem>>, vector<32x128xbf16>
    tpu.vector_store %arg17[%c0_11, %c0_12], %28 {strides = array<i32>} : memref<32x512xbf16, #tpu.memory_space<vmem>>, vector<32x128xbf16>,
    %30 = vector.extract_strided_slice %10 {offsets = [0, 128], sizes = [32, 128], strides = [1, 1]} : vector<32x512xf32> to vector<32x128xf32>
    %31 = arith.truncf %30 : vector<32x128xf32> to vector<32x128xbf16>
    %c0_13 = arith.constant 0 : index
    %c128 = arith.constant 128 : index
    %32 = vector.load %arg16[%c0_13, %c128] : memref<32x1024xbf16, #tpu.memory_space<vmem>>, vector<32x128xbf16>
    %c0_14 = arith.constant 0 : index
    %c640 = arith.constant 640 : index
    %33 = vector.load %arg16[%c0_14, %c640] : memref<32x1024xbf16, #tpu.memory_space<vmem>>, vector<32x128xbf16>
    %cst_15 = arith.constant dense<0.000000e+00> : vector<32x32xf32>
    %34 = tpu.matmul %31, %32, %cst_15 {dimension_numbers = #tpu.dot_dimension_numbers<[1], [1], [0], [0], [0, 0, 1, 0], [], []>} : vector<32x128xbf16>, vector<32x128xbf16>, vector<32x32xf32> -> vector<32x32xf32>
    %cst_16 = arith.constant dense<0xFF800000> : vector<32xf32>
    %35 = vector.multi_reduction <maximumf>, %34, %cst_16 [1] : vector<32x32xf32> to vector<32xf32>
    %36 = vector.shape_cast %35 : vector<32xf32> to vector<32x1xf32>
    %37 = vector.broadcast %36 : vector<32x1xf32> to vector<32x32xf32>
    %38 = arith.subf %34, %37 : vector<32x32xf32>
    %39 = math.exp %38 : vector<32x32xf32>
    %cst_17 = arith.constant dense<0.000000e+00> : vector<32xf32>
    %40 = vector.multi_reduction <add>, %39, %cst_17 [1] : vector<32x32xf32> to vector<32xf32>
    %41 = vector.shape_cast %40 : vector<32xf32> to vector<32x1xf32>
    %42 = arith.truncf %39 : vector<32x32xf32> to vector<32x32xbf16>
    %cst_18 = arith.constant dense<0.000000e+00> : vector<32x128xf32>
    %43 = tpu.matmul %42, %33, %cst_18 {dimension_numbers = #tpu.dot_dimension_numbers<[1], [0], [0], [1], [0, 0, 1, 1], [], []>} : vector<32x32xbf16>, vector<32x128xbf16>, vector<32x128xf32> -> vector<32x128xf32>
    %44 = tpu.reciprocal %41 {approx = true} : vector<32x1xf32> -> vector<32x1xf32>
    %45 = vector.broadcast %44 : vector<32x1xf32> to vector<32x128xf32>
    %46 = arith.mulf %43, %45 : vector<32x128xf32>
    %47 = arith.truncf %46 : vector<32x128xf32> to vector<32x128xbf16>
    %c0_19 = arith.constant 0 : index
    %c128_20 = arith.constant 128 : index
    %48 = vector.load %arg17[%c0_19, %c128_20] : memref<32x512xbf16, #tpu.memory_space<vmem>>, vector<32x128xbf16>
    tpu.vector_store %arg17[%c0_19, %c128_20], %47 {strides = array<i32>} : memref<32x512xbf16, #tpu.memory_space<vmem>>, vector<32x128xbf16>,
    %49 = vector.extract_strided_slice %10 {offsets = [0, 256], sizes = [32, 128], strides = [1, 1]} : vector<32x512xf32> to vector<32x128xf32>
    %50 = arith.truncf %49 : vector<32x128xf32> to vector<32x128xbf16>
    %c0_21 = arith.constant 0 : index
    %c256 = arith.constant 256 : index
    %51 = vector.load %arg16[%c0_21, %c256] : memref<32x1024xbf16, #tpu.memory_space<vmem>>, vector<32x128xbf16>
    %c0_22 = arith.constant 0 : index
    %c768 = arith.constant 768 : index
    %52 = vector.load %arg16[%c0_22, %c768] : memref<32x1024xbf16, #tpu.memory_space<vmem>>, vector<32x128xbf16>
    %cst_23 = arith.constant dense<0.000000e+00> : vector<32x32xf32>
    %53 = tpu.matmul %50, %51, %cst_23 {dimension_numbers = #tpu.dot_dimension_numbers<[1], [1], [0], [0], [0, 0, 1, 0], [], []>} : vector<32x128xbf16>, vector<32x128xbf16>, vector<32x32xf32> -> vector<32x32xf32>
    %cst_24 = arith.constant dense<0xFF800000> : vector<32xf32>
    %54 = vector.multi_reduction <maximumf>, %53, %cst_24 [1] : vector<32x32xf32> to vector<32xf32>
    %55 = vector.shape_cast %54 : vector<32xf32> to vector<32x1xf32>
    %56 = vector.broadcast %55 : vector<32x1xf32> to vector<32x32xf32>
    %57 = arith.subf %53, %56 : vector<32x32xf32>
    %58 = math.exp %57 : vector<32x32xf32>
    %cst_25 = arith.constant dense<0.000000e+00> : vector<32xf32>
    %59 = vector.multi_reduction <add>, %58, %cst_25 [1] : vector<32x32xf32> to vector<32xf32>
    %60 = vector.shape_cast %59 : vector<32xf32> to vector<32x1xf32>
    %61 = arith.truncf %58 : vector<32x32xf32> to vector<32x32xbf16>
    %cst_26 = arith.constant dense<0.000000e+00> : vector<32x128xf32>
    %62 = tpu.matmul %61, %52, %cst_26 {dimension_numbers = #tpu.dot_dimension_numbers<[1], [0], [0], [1], [0, 0, 1, 1], [], []>} : vector<32x32xbf16>, vector<32x128xbf16>, vector<32x128xf32> -> vector<32x128xf32>
    %63 = tpu.reciprocal %60 {approx = true} : vector<32x1xf32> -> vector<32x1xf32>
    %64 = vector.broadcast %63 : vector<32x1xf32> to vector<32x128xf32>
    %65 = arith.mulf %62, %64 : vector<32x128xf32>
    %66 = arith.truncf %65 : vector<32x128xf32> to vector<32x128xbf16>
    %c0_27 = arith.constant 0 : index
    %c256_28 = arith.constant 256 : index
    %67 = vector.load %arg17[%c0_27, %c256_28] : memref<32x512xbf16, #tpu.memory_space<vmem>>, vector<32x128xbf16>
    tpu.vector_store %arg17[%c0_27, %c256_28], %66 {strides = array<i32>} : memref<32x512xbf16, #tpu.memory_space<vmem>>, vector<32x128xbf16>,
    %68 = vector.extract_strided_slice %10 {offsets = [0, 384], sizes = [32, 128], strides = [1, 1]} : vector<32x512xf32> to vector<32x128xf32>
    %69 = arith.truncf %68 : vector<32x128xf32> to vector<32x128xbf16>
    %c0_29 = arith.constant 0 : index
    %c384 = arith.constant 384 : index
    %70 = vector.load %arg16[%c0_29, %c384] : memref<32x1024xbf16, #tpu.memory_space<vmem>>, vector<32x128xbf16>
    %c0_30 = arith.constant 0 : index
    %c896 = arith.constant 896 : index
    %71 = vector.load %arg16[%c0_30, %c896] : memref<32x1024xbf16, #tpu.memory_space<vmem>>, vector<32x128xbf16>
    %cst_31 = arith.constant dense<0.000000e+00> : vector<32x32xf32>
    %72 = tpu.matmul %69, %70, %cst_31 {dimension_numbers = #tpu.dot_dimension_numbers<[1], [1], [0], [0], [0, 0, 1, 0], [], []>} : vector<32x128xbf16>, vector<32x128xbf16>, vector<32x32xf32> -> vector<32x32xf32>
    %cst_32 = arith.constant dense<0xFF800000> : vector<32xf32>
    %73 = vector.multi_reduction <maximumf>, %72, %cst_32 [1] : vector<32x32xf32> to vector<32xf32>
    %74 = vector.shape_cast %73 : vector<32xf32> to vector<32x1xf32>
    %75 = vector.broadcast %74 : vector<32x1xf32> to vector<32x32xf32>
    %76 = arith.subf %72, %75 : vector<32x32xf32>
    %77 = math.exp %76 : vector<32x32xf32>
    %cst_33 = arith.constant dense<0.000000e+00> : vector<32xf32>
    %78 = vector.multi_reduction <add>, %77, %cst_33 [1] : vector<32x32xf32> to vector<32xf32>
    %79 = vector.shape_cast %78 : vector<32xf32> to vector<32x1xf32>
    %80 = arith.truncf %77 : vector<32x32xf32> to vector<32x32xbf16>
    %cst_34 = arith.constant dense<0.000000e+00> : vector<32x128xf32>
    %81 = tpu.matmul %80, %71, %cst_34 {dimension_numbers = #tpu.dot_dimension_numbers<[1], [0], [0], [1], [0, 0, 1, 1], [], []>} : vector<32x32xbf16>, vector<32x128xbf16>, vector<32x128xf32> -> vector<32x128xf32>
    %82 = tpu.reciprocal %79 {approx = true} : vector<32x1xf32> -> vector<32x1xf32>
    %83 = vector.broadcast %82 : vector<32x1xf32> to vector<32x128xf32>
    %84 = arith.mulf %81, %83 : vector<32x128xf32>
    %85 = arith.truncf %84 : vector<32x128xf32> to vector<32x128xbf16>
    %c0_35 = arith.constant 0 : index
    %c384_36 = arith.constant 384 : index
    %86 = vector.load %arg17[%c0_35, %c384_36] : memref<32x512xbf16, #tpu.memory_space<vmem>>, vector<32x128xbf16>
    tpu.vector_store %arg17[%c0_35, %c384_36], %85 {strides = array<i32>} : memref<32x512xbf16, #tpu.memory_space<vmem>>, vector<32x128xbf16>,
    %c0_37 = arith.constant 0 : index
    %c0_38 = arith.constant 0 : index
    %87 = vector.load %arg17[%c0_37, %c0_38] : memref<32x512xbf16, #tpu.memory_space<vmem>>, vector<32x512xbf16>
    %c0_39 = arith.constant 0 : index
    %c0_40 = arith.constant 0 : index
    %88 = vector.load %arg5[%c0_39, %c0_40] : memref<512x128xbf16, #tpu.memory_space<vmem>>, vector<512x128xbf16>
    %cst_41 = arith.constant dense<0.000000e+00> : vector<32x128xf32>
    %89 = tpu.matmul %87, %88, %cst_41 {dimension_numbers = #tpu.dot_dimension_numbers<[1], [0], [0], [1], [0, 0, 1, 1], [], []>} : vector<32x512xbf16>, vector<512x128xbf16>, vector<32x128xf32> -> vector<32x128xf32>
    %c0_42 = arith.constant 0 : index
    %c0_43 = arith.constant 0 : index
    %90 = vector.load %arg6[%c0_42, %c0_43] : memref<1x128xf32, #tpu.memory_space<vmem>>, vector<1x128xf32>
    %91 = vector.shape_cast %90 : vector<1x128xf32> to vector<128xf32>
    %92 = vector.shape_cast %91 : vector<128xf32> to vector<1x128xf32>
    %93 = vector.broadcast %92 : vector<1x128xf32> to vector<32x128xf32>
    %94 = arith.addf %89, %93 : vector<32x128xf32>
    %95 = arith.addf %94, %7 : vector<32x128xf32>
    %c0_44 = arith.constant 0 : index
    %c0_45 = arith.constant 0 : index
    %96 = vector.load %arg7[%c0_44, %c0_45] : memref<1x128xf32, #tpu.memory_space<vmem>>, vector<1x128xf32>
    %97 = vector.shape_cast %96 : vector<1x128xf32> to vector<128xf32>
    %c0_46 = arith.constant 0 : index
    %c0_47 = arith.constant 0 : index
    %98 = vector.load %arg8[%c0_46, %c0_47] : memref<1x128xf32, #tpu.memory_space<vmem>>, vector<1x128xf32>
    %99 = vector.shape_cast %98 : vector<1x128xf32> to vector<128xf32>
    %cst_48 = arith.constant dense<0.000000e+00> : vector<32xf32>
    %100 = vector.multi_reduction <add>, %95, %cst_48 [1] : vector<32x128xf32> to vector<32xf32>
    %101 = vector.shape_cast %100 : vector<32xf32> to vector<32x1xf32>
    %cst_49 = arith.constant 1.280000e+02 : f32
    %102 = vector.broadcast %cst_49 : f32 to vector<32x1xf32>
    %103 = arith.divf %101, %102 : vector<32x1xf32>
    %104 = vector.broadcast %103 : vector<32x1xf32> to vector<32x128xf32>
    %105 = arith.subf %95, %104 : vector<32x128xf32>
    %106 = arith.mulf %105, %105 : vector<32x128xf32>
    %cst_50 = arith.constant dense<0.000000e+00> : vector<32xf32>
    %107 = vector.multi_reduction <add>, %106, %cst_50 [1] : vector<32x128xf32> to vector<32xf32>
    %108 = vector.shape_cast %107 : vector<32xf32> to vector<32x1xf32>
    %cst_51 = arith.constant 1.280000e+02 : f32
    %109 = vector.broadcast %cst_51 : f32 to vector<32x1xf32>
    %110 = arith.divf %108, %109 : vector<32x1xf32>
    %111 = vector.broadcast %103 : vector<32x1xf32> to vector<32x128xf32>
    %112 = arith.subf %95, %111 : vector<32x128xf32>
    %cst_52 = arith.constant 9.99999974E-6 : f32
    %113 = vector.broadcast %cst_52 : f32 to vector<32x1xf32>
    %114 = arith.addf %110, %113 : vector<32x1xf32>
    %115 = math.rsqrt %114 : vector<32x1xf32>
    %116 = vector.broadcast %115 : vector<32x1xf32> to vector<32x128xf32>
    %117 = arith.mulf %112, %116 : vector<32x128xf32>
    %118 = vector.shape_cast %97 : vector<128xf32> to vector<1x128xf32>
    %119 = vector.broadcast %118 : vector<1x128xf32> to vector<32x128xf32>
    %120 = arith.mulf %117, %119 : vector<32x128xf32>
    %121 = vector.shape_cast %99 : vector<128xf32> to vector<1x128xf32>
    %122 = vector.broadcast %121 : vector<1x128xf32> to vector<32x128xf32>
    %123 = arith.addf %120, %122 : vector<32x128xf32>
    %124 = arith.truncf %123 : vector<32x128xf32> to vector<32x128xbf16>
    %c0_53 = arith.constant 0 : index
    %c0_54 = arith.constant 0 : index
    %125 = vector.load %arg9[%c0_53, %c0_54] : memref<128x512xbf16, #tpu.memory_space<vmem>>, vector<128x512xbf16>
    %cst_55 = arith.constant dense<0.000000e+00> : vector<32x512xf32>
    %126 = tpu.matmul %124, %125, %cst_55 {dimension_numbers = #tpu.dot_dimension_numbers<[1], [0], [0], [1], [0, 0, 1, 1], [], []>} : vector<32x128xbf16>, vector<128x512xbf16>, vector<32x512xf32> -> vector<32x512xf32>
    %c0_56 = arith.constant 0 : index
    %c0_57 = arith.constant 0 : index
    %127 = vector.load %arg10[%c0_56, %c0_57] : memref<1x512xf32, #tpu.memory_space<vmem>>, vector<1x512xf32>
    %128 = vector.shape_cast %127 : vector<1x512xf32> to vector<512xf32>
    %129 = vector.shape_cast %128 : vector<512xf32> to vector<1x512xf32>
    %130 = vector.broadcast %129 : vector<1x512xf32> to vector<32x512xf32>
    %131 = arith.addf %126, %130 : vector<32x512xf32>
    %cst_58 = arith.constant 0.000000e+00 : f32
    %132 = vector.broadcast %cst_58 : f32 to vector<32x512xf32>
    %133 = arith.maximumf %131, %132 : vector<32x512xf32>
    %134 = arith.truncf %133 : vector<32x512xf32> to vector<32x512xbf16>
    %c0_59 = arith.constant 0 : index
    %c0_60 = arith.constant 0 : index
    %135 = vector.load %arg11[%c0_59, %c0_60] : memref<512x128xbf16, #tpu.memory_space<vmem>>, vector<512x128xbf16>
    %cst_61 = arith.constant dense<0.000000e+00> : vector<32x128xf32>
    %136 = tpu.matmul %134, %135, %cst_61 {dimension_numbers = #tpu.dot_dimension_numbers<[1], [0], [0], [1], [0, 0, 1, 1], [], []>} : vector<32x512xbf16>, vector<512x128xbf16>, vector<32x128xf32> -> vector<32x128xf32>
    %c0_62 = arith.constant 0 : index
    %c0_63 = arith.constant 0 : index
    %137 = vector.load %arg12[%c0_62, %c0_63] : memref<1x128xf32, #tpu.memory_space<vmem>>, vector<1x128xf32>
    %138 = vector.shape_cast %137 : vector<1x128xf32> to vector<128xf32>
    %139 = vector.shape_cast %138 : vector<128xf32> to vector<1x128xf32>
    %140 = vector.broadcast %139 : vector<1x128xf32> to vector<32x128xf32>
    %141 = arith.addf %136, %140 : vector<32x128xf32>
    %142 = arith.addf %141, %123 : vector<32x128xf32>
    %c0_64 = arith.constant 0 : index
    %c0_65 = arith.constant 0 : index
    %143 = vector.load %arg13[%c0_64, %c0_65] : memref<1x128xf32, #tpu.memory_space<vmem>>, vector<1x128xf32>
    %144 = vector.shape_cast %143 : vector<1x128xf32> to vector<128xf32>
    %c0_66 = arith.constant 0 : index
    %c0_67 = arith.constant 0 : index
    %145 = vector.load %arg14[%c0_66, %c0_67] : memref<1x128xf32, #tpu.memory_space<vmem>>, vector<1x128xf32>
    %146 = vector.shape_cast %145 : vector<1x128xf32> to vector<128xf32>
    %cst_68 = arith.constant dense<0.000000e+00> : vector<32xf32>
    %147 = vector.multi_reduction <add>, %142, %cst_68 [1] : vector<32x128xf32> to vector<32xf32>
    %148 = vector.shape_cast %147 : vector<32xf32> to vector<32x1xf32>
    %cst_69 = arith.constant 1.280000e+02 : f32
    %149 = vector.broadcast %cst_69 : f32 to vector<32x1xf32>
    %150 = arith.divf %148, %149 : vector<32x1xf32>
    %151 = vector.broadcast %150 : vector<32x1xf32> to vector<32x128xf32>
    %152 = arith.subf %142, %151 : vector<32x128xf32>
    %153 = arith.mulf %152, %152 : vector<32x128xf32>
    %cst_70 = arith.constant dense<0.000000e+00> : vector<32xf32>
    %154 = vector.multi_reduction <add>, %153, %cst_70 [1] : vector<32x128xf32> to vector<32xf32>
    %155 = vector.shape_cast %154 : vector<32xf32> to vector<32x1xf32>
    %cst_71 = arith.constant 1.280000e+02 : f32
    %156 = vector.broadcast %cst_71 : f32 to vector<32x1xf32>
    %157 = arith.divf %155, %156 : vector<32x1xf32>
    %158 = vector.broadcast %150 : vector<32x1xf32> to vector<32x128xf32>
    %159 = arith.subf %142, %158 : vector<32x128xf32>
    %cst_72 = arith.constant 9.99999974E-6 : f32
    %160 = vector.broadcast %cst_72 : f32 to vector<32x1xf32>
    %161 = arith.addf %157, %160 : vector<32x1xf32>
    %162 = math.rsqrt %161 : vector<32x1xf32>
    %163 = vector.broadcast %162 : vector<32x1xf32> to vector<32x128xf32>
    %164 = arith.mulf %159, %163 : vector<32x128xf32>
    %165 = vector.shape_cast %144 : vector<128xf32> to vector<1x128xf32>
    %166 = vector.broadcast %165 : vector<1x128xf32> to vector<32x128xf32>
    %167 = arith.mulf %164, %166 : vector<32x128xf32>
    %168 = vector.shape_cast %146 : vector<128xf32> to vector<1x128xf32>
    %169 = vector.broadcast %168 : vector<1x128xf32> to vector<32x128xf32>
    %170 = arith.addf %167, %169 : vector<32x128xf32>
    %c0_73 = arith.constant 0 : index
    %c0_74 = arith.constant 0 : index
    %c0_75 = arith.constant 0 : index
    %171 = vector.load %arg15[%c0_73, %c0_74, %c0_75] : memref<1x32x128xf32, #tpu.memory_space<vmem>>, vector<1x32x128xf32>
    %172 = vector.shape_cast %171 : vector<1x32x128xf32> to vector<32x128xf32>
    %173 = vector.shape_cast %170 : vector<32x128xf32> to vector<1x32x128xf32>
    tpu.vector_store %arg15[%c0_73, %c0_74, %c0_75], %173 {strides = array<i32>} : memref<1x32x128xf32, #tpu.memory_space<vmem>>, vector<1x32x128xf32>,
    return
  }
  func.func @transform_0(%arg0: i32, %arg1: i32) -> (i32, i32, i32) {
    %c0_i32 = arith.constant 0 : i32
    %c0_i32_0 = arith.constant 0 : i32
    %c0_i32_1 = arith.constant 0 : i32
    return %arg0, %c0_i32, %c0_i32_0 : i32, i32, i32
  }
  func.func @transform_1(%arg0: i32, %arg1: i32) -> (i32, i32) {
    %c0_i32 = arith.constant 0 : i32
    %c0_i32_0 = arith.constant 0 : i32
    %c0_i32_1 = arith.constant 0 : i32
    return %c0_i32, %c0_i32_0 : i32, i32
  }
  func.func @transform_2(%arg0: i32, %arg1: i32) -> (i32, i32) {
    %c0_i32 = arith.constant 0 : i32
    %c0_i32_0 = arith.constant 0 : i32
    %c0_i32_1 = arith.constant 0 : i32
    return %c0_i32, %c0_i32_0 : i32, i32
  }
  func.func @transform_3(%arg0: i32, %arg1: i32) -> (i32, i32) {
    %c0_i32 = arith.constant 0 : i32
    %c0_i32_0 = arith.constant 0 : i32
    %c0_i32_1 = arith.constant 0 : i32
    return %c0_i32, %c0_i32_0 : i32, i32
  }
  func.func @transform_4(%arg0: i32, %arg1: i32) -> (i32, i32) {
    %c0_i32 = arith.constant 0 : i32
    %c0_i32_0 = arith.constant 0 : i32
    %c0_i32_1 = arith.constant 0 : i32
    return %c0_i32, %c0_i32_0 : i32, i32
  }
  func.func @transform_5(%arg0: i32, %arg1: i32) -> (i32, i32) {
    %c0_i32 = arith.constant 0 : i32
    %c0_i32_0 = arith.constant 0 : i32
    %c0_i32_1 = arith.constant 0 : i32
    return %c0_i32, %c0_i32_0 : i32, i32
  }
  func.func @transform_6(%arg0: i32, %arg1: i32) -> (i32, i32) {
    %c0_i32 = arith.constant 0 : i32
    %c0_i32_0 = arith.constant 0 : i32
    %c0_i32_1 = arith.constant 0 : i32
    return %c0_i32, %c0_i32_0 : i32, i32
  }
  func.func @transform_7(%arg0: i32, %arg1: i32) -> (i32, i32) {
    %c0_i32 = arith.constant 0 : i32
    %c0_i32_0 = arith.constant 0 : i32
    %c0_i32_1 = arith.constant 0 : i32
    return %c0_i32, %c0_i32_0 : i32, i32
  }
  func.func @transform_8(%arg0: i32, %arg1: i32) -> (i32, i32) {
    %c0_i32 = arith.constant 0 : i32
    %c0_i32_0 = arith.constant 0 : i32
    %c0_i32_1 = arith.constant 0 : i32
    return %c0_i32, %c0_i32_0 : i32, i32
  }
  func.func @transform_9(%arg0: i32, %arg1: i32) -> (i32, i32) {
    %c0_i32 = arith.constant 0 : i32
    %c0_i32_0 = arith.constant 0 : i32
    %c0_i32_1 = arith.constant 0 : i32
    return %c0_i32, %c0_i32_0 : i32, i32
  }
  func.func @transform_10(%arg0: i32, %arg1: i32) -> (i32, i32) {
    %c0_i32 = arith.constant 0 : i32
    %c0_i32_0 = arith.constant 0 : i32
    %c0_i32_1 = arith.constant 0 : i32
    return %c0_i32, %c0_i32_0 : i32, i32
  }
  func.func @transform_11(%arg0: i32, %arg1: i32) -> (i32, i32) {
    %c0_i32 = arith.constant 0 : i32
    %c0_i32_0 = arith.constant 0 : i32
    %c0_i32_1 = arith.constant 0 : i32
    return %c0_i32, %c0_i32_0 : i32, i32
  }
  func.func @transform_12(%arg0: i32, %arg1: i32) -> (i32, i32) {
    %c0_i32 = arith.constant 0 : i32
    %c0_i32_0 = arith.constant 0 : i32
    %c0_i32_1 = arith.constant 0 : i32
    return %c0_i32, %c0_i32_0 : i32, i32
  }
  func.func @transform_13(%arg0: i32, %arg1: i32) -> (i32, i32, i32) {
    %c0_i32 = arith.constant 0 : i32
    %c0_i32_0 = arith.constant 0 : i32
    return %arg0, %arg1, %c0_i32 : i32, i32, i32
  }
}

</mosaic_0001>

<bundles_post_ra>
// kernel: tpu_custom_call.1
= control target key start
LH: loop header
LB: loop body
LE: loop exit
PB: predicated region body
PF: predicated region fallthrough
CT: control target
= control target key end

     0   :  { %s5535_s0 = inlined_call_operand.hbm [shape: f32[2,32,128], index: 0, kind: input, shape index: {}]   ;;  %s5536_s1 = inlined_call_operand.hbm [shape: bf16[128,512], index: 1, kind: input, shape index: {}]   ;;  %s5537_s2 = inlined_call_operand.hbm [shape: bf16[128,1024], index: 2, kind: input, shape index: {}]   ;;  %s5538_s3 = inlined_call_operand.hbm [shape: bf16[512,128], index: 3, kind: input, shape index: {}]   ;;  %s5539_s4 = inlined_call_operand.vmem [shape: f32[1,128], index: 4, kind: input, shape index: {}]   ;;  %s5540_s5 = inlined_call_operand.vmem [shape: f32[1,128], index: 5, kind: input, shape index: {}]   ;;  %s5541_s6 = inlined_call_operand.vmem [shape: f32[1,128], index: 6, kind: input, shape index: {}]   ;;  %s5542_s7 = inlined_call_operand.hbm [shape: bf16[128,512], index: 7, kind: input, shape index: {}]   ;;  %s5543_s8 = inlined_call_operand.vmem [shape: f32[1,512], index: 8, kind: input, shape index: {}]   ;;  %s5544_s9 = inlined_call_operand.hbm [shape: bf16[512,128], index: 9, kind: input, shape index: {}]   ;;  %s5545_s10 = inlined_call_operand.vmem [shape: f32[1,128], index: 10, kind: input, shape index: {}]   ;;  %s5546_s11 = inlined_call_operand.vmem [shape: f32[1,128], index: 11, kind: input, shape index: {}]   ;;  %s5547_s12 = inlined_call_operand.vmem [shape: f32[1,128], index: 12, kind: input, shape index: {}]   ;;  %s5548_s13 = inlined_call_operand.hbm [shape: f32[2,32,128], index: 13, kind: output, shape index: {}]  }
   0x1   :  { %5558 = sst [smem:[#allocation25_spill]] %s5536_s1 }
   0x2   :  { %5559 = sst [smem:[#allocation26_spill]] %s5537_s2 }
   0x3   :  { %5560 = sst [smem:[#allocation27_spill]] %s5538_s3 }
   0x4   :  { %5561 = sst [smem:[#allocation28_spill]] %s5542_s7 }
   0x5   :  { %5562 = sst [smem:[#allocation29_spill]] %s5544_s9 }
   0x6   :  { %5563 = sst [smem:[#allocation30_spill]] %s5548_s13 }
   0x7   :  { %18 = vsyncpa [#allocation5], 0 }
   0x8   :  { %20 = vsyncpa [#allocation5 + $0x1], 0 }
   0x9   :  { %21 = vsyncpa [#allocation8], 0 }
   0xa   :  { %22 = vsyncpa [#allocation11], 0 }
   0xb   :  { %23 = vsyncpa [#allocation14], 0 }
   0xc   :  { %24 = vsyncpa [#allocation6], 0 }
   0xd   :  { %26 = vsyncpa [#allocation6 + $0x1], 0  ;;  %s5049_s25 = smov 0   ;;  %s5051_s26 = smov 0  }
   0xe   :  { %s5053_s27 = smov 0   ;;  %s5055_s28 = smov 0  }
   0xf   :  { %s5057_s29 = smov 0   ;;  %s5059_s30 = smov 0  }
  0x10 LB: > { %5564 = sst [smem:[#allocation21_spill]] %s4951_s28  ;;  %s5549_s14 = sadd.s32 4294967295, %s4959_s30   ;;  %s4959_s30 = sphi %s5059_s30, %s32_s30   ;;  %s4955_s29 = sphi %s5057_s29, %s5594_s29   ;;  %s4951_s28 = sphi %s5055_s28, %s5593_s28   ;;  %s4947_s27 = sphi %s5053_s27, %s5597_s27   ;;  %s4943_s26 = sphi %s5051_s26, %s5596_s26   ;;  %s4939_s25 = sphi %s5049_s25, %s5595_s25  }
  0x11   : > { %5565 = sst [smem:[#allocation22_spill]] %s4955_s29  ;;  %p3802_p0 = scmp.ge.s32.totalorder %s4959_s30, 1 }
  0x12   : > { %p5083_p1 = scmp.eq.s32.totalorder %s5549_s14, 0  ;;  %p355_p2 = scmp.lt.s32.totalorder %s4959_s30, 3 }
  0x13   : > { %s4961_s17 = smov [#allocation7]   ;;  %s4962_s20 = smov [#allocation10]  }
  0x14   : > { %p5088_p3 = pnand %p3802_p0, %p355_p2  ;;  %s367_s18 = sshll.u32 %s4961_s17, 4  ;;  %s368_s18 = int_to_ptr.vmem [resolvable:$true] %s367_s18 }
  0x15   : > { %s393_s21 = sshll.u32 %s4962_s20, 4  ;;  %s4720_s23 = scalar_lea.vmem %s368_s18, 4096  ;;  %s394_s21 = int_to_ptr.vmem [resolvable:$true] %s393_s21 }
  0x16   : > { %p4353_p4 = pneg %p5088_p3  ;;  %p4721_p8 = scmp.ne.s32.totalorder %s368_s18, %s4720_s23 }
  0x17   : > { %p4728_p11 = scmp.lt.s32.totalorder %s368_s18, %s368_s18  ;;  %p4729_p12 = scmp.lt.s32.totalorder %s4720_s23, %s4720_s23 }
  0x18   : > { %p5097_p6 = pnand %p4353_p4, %p5083_p1 }
  0x19   : > { %p4730_p13 = por %p4729_p12, %p4728_p11 }
  0x1a   : > { %p5103_p7 = pneg %p5097_p6 }
  0x1c   : > { %p4723_p9 = pnand %p4721_p8, %p5103_p7 }
  0x1e   : > { %p4724_p10 = pneg %p4723_p9 }
  0x20   : > { %p4731_p0 = pnand %p4730_p13, %p4724_p10 }
  0x22   : > { %4734 = shalt.err (!%p4731_p0)
}
  0x23   : > { %s5551_s24 = smov 256   ;;  %s5552_s17 = smov 16  }
  0x24   : > { %s5570_s1 = sld [smem:[#allocation25_spill]]  ;;  %s4746_s13 = scalar_lea.vmem %s394_s21, 4096 }
  0x25   : > { %p4747_p2 = scmp.ne.s32.totalorder %s394_s21, %s4746_s13  ;;  %p4754_p9 = scmp.lt.s32.totalorder %s394_s21, %s394_s21 }
  0x26   : > { %p4755_p10 = scmp.lt.s32.totalorder %s4746_s13, %s4746_s13 }
  0x27   : > { %p4749_p4 = pnand %p4747_p2, %p5103_p7 }
  0x28   : > { %p4756_p11 = por %p4755_p10, %p4754_p9 }
  0x29   : > { %p4750_p8 = pneg %p4749_p4 }
  0x2a   : > { %4356 = dma.hbm_to_vmem [thread:$0]  (!%p5097_p6), %s5570_s1, 4096, %s368_s18, [#allocation8], %s5551_s24, %s5551_s24, %s5552_s17  }
  0x2b   : > { %p4757_p12 = pnand %p4756_p11, %p4750_p8 }
  0x2d   : > { %4760 = shalt.err (!%p4757_p12)
}
  0x2e   : > { %s5553_s23 = smov 64   ;;  %s5554_s28 = smov 4  }
  0x2f   : > { %s5571_s3 = sld [smem:[#allocation27_spill]]  ;;  %s4967_s20 = smov [#allocation9]  }
  0x30   : > { %s380_s24 = sshll.u32 %s4967_s20, 4  ;;  %s381_s24 = int_to_ptr.vmem [resolvable:$true] %s380_s24 }
  0x31   : > { %s4772_s17 = scalar_lea.vmem %s381_s24, 8192  ;;  %p4780_p4 = scmp.lt.s32.totalorder %s381_s24, %s381_s24 }
  0x32   : > { %p4773_p13 = scmp.ne.s32.totalorder %s381_s24, %s4772_s17  ;;  %p4781_p8 = scmp.lt.s32.totalorder %s4772_s17, %s4772_s17 }
  0x34   : > { %p4775_p0 = pnand %p4773_p13, %p5103_p7  ;;  %p4782_p9 = por %p4781_p8, %p4780_p4 }
  0x35   : > { %4362 = dma.hbm_to_vmem [thread:$0]  (!%p5097_p6), %s5571_s3, 4096, %s394_s21, [#allocation11], %s5553_s23, %s5553_s23, %s5554_s28  }
  0x36   : > { %p4776_p2 = pneg %p4775_p0 }
  0x38   : > { %p4783_p10 = pnand %p4782_p9, %p4776_p2 }
  0x3a   : > { %4786 = shalt.err (!%p4783_p10)
}
  0x3b   : > { %s4968_s13 = smov 512   ;;  %s4969_s1 = smov 32  }
  0x3c   : > { %s5572_s2 = sld [smem:[#allocation26_spill]]  ;;  %s4970_s18 = smov [#allocation12]  }
  0x3d   : > { %s415_s20 = sshll.u32 %s4970_s18, 4  ;;  %s4971_s23 = smov [#allocation13]   ;;  %s416_s20 = int_to_ptr.vmem [resolvable:$true] %s415_s20 }
  0x3e   : > { %s431_s28 = sshll.u32 %s4971_s23, 4  ;;  %s4798_s3 = scalar_lea.vmem %s416_s20, 4096  ;;  %s432_s28 = int_to_ptr.vmem [resolvable:$true] %s431_s28 }
  0x3f   : > { %p4799_p11 = scmp.ne.s32.totalorder %s416_s20, %s4798_s3  ;;  %p4806_p0 = scmp.lt.s32.totalorder %s416_s20, %s416_s20 }
  0x40   : > { %p4807_p2 = scmp.lt.s32.totalorder %s4798_s3, %s4798_s3 }
  0x41   : > { %p4801_p12 = pnand %p4799_p11, %p5103_p7 }
  0x42   : > { %4359 = dma.hbm_to_vmem [thread:$0]  (!%p5097_p6), %s5572_s2, 8192, %s381_s24, [#allocation8], %s4968_s13, %s4968_s13, %s4969_s1  }
  0x43   : > { %p4802_p13 = pneg %p4801_p12  ;;  %p4808_p4 = por %p4807_p2, %p4806_p0 }
  0x45   : > { %p4809_p8 = pnand %p4808_p4, %p4802_p13 }
  0x47   : > { %4812 = shalt.err (!%p4809_p8)
}
  0x48   : > { %s5573_s17 = smov 16   ;;  %s5574_s14 = smov 256  }
  0x49   : > { %s5575_s7 = sld [smem:[#allocation28_spill]]  ;;  %s4824_s23 = scalar_lea.vmem %s432_s28, 4096 }
  0x4a   : > { %p4825_p9 = scmp.ne.s32.totalorder %s432_s28, %s4824_s23  ;;  %p4832_p12 = scmp.lt.s32.totalorder %s432_s28, %s432_s28 }
  0x4b   : > { %p4833_p0 = scmp.lt.s32.totalorder %s4824_s23, %s4824_s23 }
  0x4c   : > { %p4827_p10 = pnand %p4825_p9, %p5103_p7 }
  0x4d   : > { %p4834_p13 = por %p4833_p0, %p4832_p12 }
  0x4e   : > { %p4828_p11 = pneg %p4827_p10 }
  0x4f   : > { %4365 = dma.hbm_to_vmem [thread:$0]  (!%p5097_p6), %s5575_s7, 4096, %s416_s20, [#allocation11], %s5574_s14, %s5574_s14, %s5573_s17  }
  0x50   : > { %p4835_p2 = pnand %p4834_p13, %p4828_p11 }
  0x52   : > { %4838 = shalt.err (!%p4835_p2)
}
  0x53   : > { %s5576_s3 = smov 4   ;;  %s5577_s13 = smov 64  }
  0x54   : > { %s5578_s9 = sld [smem:[#allocation29_spill]]  ;;  %s3801_s19 = sadd.s32 4294967294, %s4959_s30  }
  0x55   : > { %s44_s22 = sadd.s32 1, %s4955_s29  ;;  %s51_s20 = sadd.s32 1, %s4947_s27 }
  0x56   : > { %p46_p7 = scmp.ge.s32.totalorder %s44_s22, 2  ;;  %p58_p4 = scmp.ne.s32.totalorder %s4947_s27, %s4943_s26 }
  0x57   : > { %p59_p8 = scmp.eq.s32.totalorder %s4959_s30, 0  ;;  %p64_p9 = scmp.ne.s32.totalorder %s4943_s26, %s4939_s25 }
  0x58   : > { %s5599_s22 = smov (%p46_p7, %s44_s22), 0  ;;  %s5582_s1 = sadd.s32 4294967295, %s4959_s30  }
  0x59   : > { %5579 = sst [smem:[#allocation23_spill]] %s5599_s22  ;;  %p5164_p10 = por %p59_p8, %p58_p4 }
  0x5a   : > { %4368 = dma.hbm_to_vmem [thread:$0]  (!%p5097_p6), %s5578_s9, 4096, %s432_s28, [#allocation14], %s5577_s13, %s5577_s13, %s5576_s3  }
  0x5b   : > { %p5170_p6 = por %p5083_p1, %p64_p9  ;;  %s48_s14 = ssub.s32 %s4955_s29, %s5599_s22 }
  0x5c   : > { %p342_p11 = scmp.eq.s32.totalorder %s5582_s1, 1  ;;  %p49_p12 = scmp.eq.s32.totalorder %s48_s14, 0 }
  0x5d   : > { %p348_p0 = scmp.eq.s32.totalorder %s3801_s19, 1  ;;  %p4382_p2 = scmp.lt.s32.totalorder %s4959_s30, 2 }
  0x5e   : > { %p5178_p13 = por %p342_p11, %p58_p4  ;;  %s454_s13 = sand.u32 1, %s4947_s27  }
  0x5f   : > { %s5184_s23 = scalar_select %p49_p12, %s4947_s27, %s51_s20  }
  0x60   : > { %s5583_s24 = scalar_select %p5178_p13, 1, 0 }
  0x61   : > { %5584 = sst [smem:[#allocation24_spill]] %s5184_s23  ;;  %p5186_p7 = por %p348_p0, %p64_p9 }
  0x62   : > { %s3809_s21 = sshll.u32 %s454_s13, 5  ;;  %s4087_s18 = sshll.u32 %s4955_s29, 9 }
  0x63   : > { %s5585_s3 = scalar_select %p5186_p7, 1, 0 }
  0x64   : > { %s464_s1 = scalar_lea.hbm %s5535_s0, %s4087_s18  ;;  %s458_s14 = scalar_lea.vmem [#allocation4], %s3809_s21 }
  0x65   : > { %s465_s19 = sshll.u32 %s458_s14, 4  ;;  %p5197_p4 = pnand %p4382_p2, %p5164_p10  ;;  %s466_s19 = int_to_ptr.vmem [resolvable:$true] %s465_s19 }
  0x66   : > { %s455_s20 = scalar_lea.sflag [#allocation5], %s454_s13  ;;  %s4852_s22 = scalar_lea.vmem %s466_s19, 512 }
  0x67   : > { %p4841_p8 = pneg %p5197_p4  ;;  %p4853_p9 = scmp.ne.s32.totalorder %s466_s19, %s4852_s22 }
  0x68   : > { %s4972_s29 = smov [#allocation4]  }
  0x69   : > { %p4855_p11 = pnand %p4853_p9, %p4841_p8  ;;  %s4857_s23 = sshll.u32 %s4972_s29, 4  ;;  %s4858_s23 = int_to_ptr.vmem [resolvable:$false] %s4857_s23 }
  0x6a   : > { %s4859_s2 = scalar_lea.vmem %s4858_s23, 1024  ;;  %p4860_p0 = scmp.lt.s32.totalorder %s466_s19, %s4858_s23 }
  0x6b   : > { %p4856_p12 = pneg %p4855_p11  ;;  %p4861_p5 = scmp.lt.s32.totalorder %s4859_s2, %s4852_s22 }
  0x6d   : > { %p4862_p7 = por %p4861_p5, %p4860_p0 }
  0x6f   : > { %p4863_p13 = pnand %p4862_p7, %p4856_p12 }
  0x71   : > { %4866 = shalt.err (!%p4863_p13)
}
  0x72   : > { %s4973_s7 = smov 128   ;;  %s4974_s17 = smov 8  }
  0x73   : > { %4372 = dma.hbm_to_vmem [thread:$0]  (!%p5197_p4), %s464_s1, 512, %s466_s19, %s455_s20, %s4973_s7, %s4973_s7, %s4974_s17  }
  0x74   : > { %477 = sbr.rel (%p5088_p3) target bundleno = 3035 (0xbdb), region = 72  ;;  %s5208_s13 = sand.u32 (!%p5088_p3), 1, %s4943_s26  }
  0x75   : > { %s3813_s29 = sshll.u32 (!%p5088_p3), %s5208_s13, 5  ;;  %s480_s22 = scalar_lea.sflag (!%p5088_p3), [#allocation5], %s5208_s13 }
  0x76   : > { %s5214_s23 = scalar_lea.vmem (!%p5088_p3), [#allocation4], %s3813_s29 }
  0x79   : > { %4918 = dma.done.wait (%p5170_p6), %s480_s22, 512  }
  0x7a   : > { %4920 = vsyncadd (%p5170_p6), %s480_s22, 4294966784 }
  0x7b   : > { %4922 = dma.done.wait (%p5083_p1), [#allocation8], 12288  }
  0x7c   : > { %4924 = vsyncadd (%p5083_p1), [#allocation8], 4294955008 }
  0x7d   : > { %4926 = dma.done.wait (%p5083_p1), [#allocation11], 8192  }
  0x7e   : > { %4928 = vsyncadd (%p5083_p1), [#allocation11], 4294959104 }
  0x7f   : > { %4930 = dma.done.wait (%p5083_p1), [#allocation14], 4096  }
  0x80   : > { %4932 = vsyncadd (%p5083_p1), [#allocation14], 4294963200  ;;  %v4975_v0 = vmov 0   ;;  %v614_v1 = vld [vmem:[#allocation9 + $0x1c0] sm:$0xff]  ;;  %v615_v30 = vld [vmem:[#allocation9 + $0x1c8] sm:$0xff]  ;;  %vm1643_vm0 = vcmask 261120  }
  0x81   : > { %974 = vmatprep.mubr.bf16.mxu0 %v4975_v0  ;;  %1027 = vmatprep.mubr.bf16.mxu1 %v4975_v0  ;;  %v618_v2 = vld [vmem:[#allocation9 + $0x1e0] sm:$0xff]  ;;  %v619_v31 = vld [vmem:[#allocation9 + $0x1e8] sm:$0xff]  ;;  %v616_v41 = vld [vmem:[#allocation9 + $0x1d0] sm:$0xff]  ;;  %s545_s9 = scalar_lea.vmem [#allocation15], %s3813_s29  ;;  %s5588_s18 = sld [smem:[#allocation30_spill]] }
  0x82   : > { %v606_v3 = vld [vmem:[#allocation9 + $0x180] sm:$0xff]  ;;  %v3877_v4 = vcombine.high %v614_v1, %v618_v2  ;;  %v3876_v5 = vcombine.low %v614_v1, %v618_v2  ;;  %v607_v32 = vld [vmem:[#allocation9 + $0x188] sm:$0xff]  ;;  %v3879_v35 = vcombine.high %v615_v30, %v619_v31  ;;  %v3878_v36 = vcombine.low %v615_v30, %v619_v31  ;;  %v620_v42 = vld [vmem:[#allocation9 + $0x1f0] sm:$0xff]  ;;  %s3666_s16 = sshll.u32 %s545_s9, 4  ;;  %s3651_s1 = scalar_lea.sflag [#allocation6], %s5208_s13  ;;  %s5487_s16 = int_to_ptr.vmem [resolvable:$true] %s3666_s16 }
  0x83   : > { %v610_v6 = vld [vmem:[#allocation9 + $0x1a0] sm:$0xff]  ;;  %v611_v33 = vld [vmem:[#allocation9 + $0x1a8] sm:$0xff]  ;;  %v608_v47 = vld [vmem:[#allocation9 + $0x190] sm:$0xff]  ;;  %v3881_v51 = vcombine.high %v616_v41, %v620_v42  ;;  %v3880_v57 = vcombine.low %v616_v41, %v620_v42  ;;  %s4867_s14 = scalar_lea.vmem %s5487_s16, 512  ;;  %p5589_p3 = scmp.ne.s32.totalorder %s5583_s24, 0 }
  0x84   : > { %v3869_v7 = vcombine.high %v606_v3, %v610_v6  ;;  %v598_v8 = vld [vmem:[#allocation9 + $0x140] sm:$0xff]  ;;  %942 = vmatprep.subr.bf16.mxu0 %v3877_v4  ;;  %v3868_v10 = vcombine.low %v606_v3, %v610_v6  ;;  %v3871_v37 = vcombine.high %v607_v32, %v611_v33  ;;  %v599_v39 = vld [vmem:[#allocation9 + $0x148] sm:$0xff]  ;;  %995 = vmatprep.subr.bf16.mxu1 %v3879_v35  ;;  %v612_v48 = vld [vmem:[#allocation9 + $0x1b0] sm:$0xff]  ;;  %p4868_p1 = scmp.ne.s32.totalorder %s5487_s16, %s4867_s14  ;;  %s4976_s19 = smov [#allocation15]  }
  0x85   : > { %v602_v9 = vld [vmem:[#allocation9 + $0x160] sm:$0xff]  ;;  %943 = vmatpush1.bf16.msra.mxu0 %v3876_v5  ;;  %v603_v40 = vld [vmem:[#allocation9 + $0x168] sm:$0xff]  ;;  %996 = vmatpush1.bf16.msra.mxu1 %v3878_v36  ;;  %v3870_v45 = vcombine.low %v607_v32, %v611_v33  ;;  %v600_v58 = vld [vmem:[#allocation9 + $0x150] sm:$0xff]  ;;  %v3873_v60 = vcombine.high %v608_v47, %v612_v48  ;;  %v3872_v2 = vcombine.low %v608_v47, %v612_v48  ;;  %s4871_s20 = sshll.u32 %s4976_s19, 4  ;;  %s4872_s20 = int_to_ptr.vmem [resolvable:$false] %s4871_s20 }
  0x86   : > { %944 = vmatprep.subr.bf16.mxu0 %v3869_v7  ;;  %v3861_v11 = vcombine.high %v598_v8, %v602_v9  ;;  %v590_v12 = vld [vmem:[#allocation9 + $0x100] sm:$0xff]  ;;  %v3860_v14 = vcombine.low %v598_v8, %v602_v9  ;;  %v553_v44 = vld [vmem:[%s5214_s23 + $0x8] sm:$0xff]  ;;  %997 = vmatprep.subr.bf16.mxu1 %v3871_v37  ;;  %v3863_v49 = vcombine.high %v599_v39, %v603_v40  ;;  %v604_v59 = vld [vmem:[#allocation9 + $0x170] sm:$0xff]  ;;  %p4869_p5 = pnand %p4868_p1, %p5589_p3  ;;  %s4873_s2 = scalar_lea.vmem %s4872_s20, 1024 }
  0x87   : > { %v594_v13 = vld [vmem:[#allocation9 + $0x120] sm:$0xff]  ;;  %v591_v50 = vld [vmem:[#allocation9 + $0x108] sm:$0xff]  ;;  %v3862_v54 = vcombine.low %v599_v39, %v603_v40  ;;  %v554_v62 = vld [vmem:[%s5214_s23 + $0x10] sm:$0xff]  ;;  %v3865_v8 = vcombine.high %v600_v58, %v604_v59  ;;  %p4874_p6 = scmp.lt.s32.totalorder %s5487_s16, %s4872_s20  ;;  %p4875_p13 = scmp.lt.s32.totalorder %s4873_s2, %s4867_s14 }
  0x88   : > { %v3853_v15 = vcombine.high %v590_v12, %v594_v13  ;;  %v582_v16 = vld [vmem:[#allocation9 + $0xc0] sm:$0xff]  ;;  %v3852_v18 = vcombine.low %v590_v12, %v594_v13  ;;  %v595_v52 = vld [vmem:[#allocation9 + $0x128] sm:$0xff]  ;;  %v555_v63 = vld [vmem:[%s5214_s23 + $0x18] sm:$0xff]  ;;  %v3864_v13 = vcombine.low %v600_v58, %v604_v59  ;;  %p4870_p10 = pneg %p4869_p5 }
  0x89   : > { %945 = vmatpush1.bf16.msra.mxu0 %v3868_v10  ;;  %v586_v17 = vld [vmem:[#allocation9 + $0xe0] sm:$0xff]  ;;  %998 = vmatpush1.bf16.msra.mxu1 %v3870_v45  ;;  %v583_v55 = vld [vmem:[#allocation9 + $0xc8] sm:$0xff]  ;;  %v3855_v61 = vcombine.high %v591_v50, %v595_v52  ;;  %v3854_v1 = vcombine.low %v591_v50, %v595_v52  ;;  %v592_v3 = vld [vmem:[#allocation9 + $0x110] sm:$0xff]  ;;  %v5242_v9 = vpack.c.bf16 %v555_v63, %v554_v62  ;;  %p4876_p2 = por %p4875_p13, %p4874_p6 }
  0x8a   : > { %946 = vmatprep.subr.bf16.mxu0 %v3861_v11  ;;  %v3845_v19 = vcombine.high %v582_v16, %v586_v17  ;;  %v574_v20 = vld [vmem:[#allocation9 + $0x80] sm:$0xff]  ;;  %v3844_v22 = vcombine.low %v582_v16, %v586_v17  ;;  %v587_v56 = vld [vmem:[#allocation9 + $0xe8] sm:$0xff]  ;;  %999 = vmatprep.subr.bf16.mxu1 %v3863_v49  ;;  %v596_v4 = vld [vmem:[#allocation9 + $0x130] sm:$0xff] }
  0x8b   : > { %v578_v21 = vld [vmem:[#allocation9 + $0xa0] sm:$0xff]  ;;  %v3847_v5 = vcombine.high %v583_v55, %v587_v56  ;;  %v575_v6 = vld [vmem:[#allocation9 + $0x88] sm:$0xff]  ;;  %v3846_v10 = vcombine.low %v583_v55, %v587_v56  ;;  %v3857_v16 = vcombine.high %v592_v3, %v596_v4  ;;  %v568_v30 = vld [vmem:[#allocation9 + $0x50] sm:$0xff]  ;;  %p4877_p7 = pnand %p4876_p2, %p4870_p10 }
  0x8c   : > { %v3837_v23 = vcombine.high %v574_v20, %v578_v21  ;;  %v566_v24 = vld [vmem:[#allocation9 + $0x40] sm:$0xff]  ;;  %v3836_v26 = vcombine.low %v574_v20, %v578_v21  ;;  %v579_v7 = vld [vmem:[#allocation9 + $0xa8] sm:$0xff]  ;;  %v3856_v21 = vcombine.low %v592_v3, %v596_v4  ;;  %v572_v31 = vld [vmem:[#allocation9 + $0x70] sm:$0xff] }
  0x8d   : > { %947 = vmatpush1.bf16.msra.mxu0 %v3860_v14  ;;  %v570_v25 = vld [vmem:[#allocation9 + $0x60] sm:$0xff]  ;;  %1000 = vmatpush1.bf16.msra.mxu1 %v3862_v54  ;;  %v567_v11 = vld [vmem:[#allocation9 + $0x48] sm:$0xff]  ;;  %v584_v14 = vld [vmem:[#allocation9 + $0xd0] sm:$0xff]  ;;  %v3839_v17 = vcombine.high %v575_v6, %v579_v7  ;;  %v3833_v41 = vcombine.high %v568_v30, %v572_v31 }
  0x8e   : > { %948 = vmatprep.subr.bf16.mxu0 %v3853_v15  ;;  %v3829_v27 = vcombine.high %v566_v24, %v570_v25  ;;  %v558_v28 = vld [vmem:[#allocation9] sm:$0xff]  ;;  %v3828_v34 = vcombine.low %v566_v24, %v570_v25  ;;  %1001 = vmatprep.subr.bf16.mxu1 %v3855_v61  ;;  %v571_v12 = vld [vmem:[#allocation9 + $0x68] sm:$0xff]  ;;  %v588_v15 = vld [vmem:[#allocation9 + $0xf0] sm:$0xff] }
  0x8f   : > { %v562_v29 = vld [vmem:[#allocation9 + $0x20] sm:$0xff]  ;;  %v563_v20 = vld [vmem:[#allocation9 + $0x28] sm:$0xff]  ;;  %v3831_v24 = vcombine.high %v567_v11, %v571_v12  ;;  %v3849_v25 = vcombine.high %v584_v14, %v588_v15  ;;  %v609_v35 = vld [vmem:[#allocation9 + $0x198] sm:$0xff] }
  0x90   : > { %v3821_v38 = vcombine.high %v558_v28, %v562_v29  ;;  %v552_v43 = vld [vmem:[%s5214_s23] sm:$0xff]  ;;  %v3820_v46 = vcombine.low %v558_v28, %v562_v29  ;;  %v621_v28 = vld [vmem:[#allocation9 + $0x1f8] sm:$0xff]  ;;  %v3848_v29 = vcombine.low %v584_v14, %v588_v15  ;;  %v564_v39 = vld [vmem:[#allocation9 + $0x30] sm:$0xff] }
  0x91   : > { %949 = vmatpush1.bf16.msra.mxu0 %v3852_v18  ;;  %v5236_v53 = vpack.c.bf16 %v553_v44, %v552_v43  ;;  %1002 = vmatpush1.bf16.msra.mxu1 %v3854_v1  ;;  %v3838_v18 = vcombine.low %v575_v6, %v579_v7  ;;  %v613_v36 = vld [vmem:[#allocation9 + $0x1b8] sm:$0xff]  ;;  %v3832_v43 = vcombine.low %v568_v30, %v572_v31  ;;  %v4453_v49 = vld [vmem:[#allocation7 + $0xe0] ss:$16 sps:$4 sm:$0xff]   ;;  %v4458_v50 = vld [vmem:[#allocation7 + $0xc4] ss:$16 sps:$4 sm:$0xff]  }
  0x92   : > { %950 = vmatprep.subr.bf16.mxu0 %v3845_v19  ;;  %1003 = vmatprep.subr.bf16.mxu1 %v3847_v5  ;;  %v559_v19 = vld [vmem:[#allocation9 + $0x8] sm:$0xff]  ;;  %v3875_v44 = vcombine.high %v609_v35, %v613_v36  ;;  %v3874_v47 = vcombine.low %v609_v35, %v613_v36  ;;  %v4461_v52 = vld [vmem:[#allocation7 + $0xa4] ss:$16 sps:$4 sm:$0xff]   ;;  %v4459_v54 = vld [vmem:[#allocation7 + $0xa0] ss:$16 sps:$4 sm:$0xff]  }
  0x93   : > { %v3823_v32 = vcombine.high %v559_v19, %v563_v20  ;;  %v4464_v55 = vld [vmem:[#allocation7 + $0x84] ss:$16 sps:$4 sm:$0xff]   ;;  %v4462_v56 = vld [vmem:[#allocation7 + $0x80] ss:$16 sps:$4 sm:$0xff]   ;;  %v605_v3 = vld [vmem:[#allocation9 + $0x178] sm:$0xff] }
  0x94   : > { %v4465_v58 = vld [vmem:[#allocation7 + $0x60] ss:$16 sps:$4 sm:$0xff]   ;;  %v4470_v59 = vld [vmem:[#allocation7 + $0x44] ss:$16 sps:$4 sm:$0xff]   ;;  %v593_v6 = vld [vmem:[#allocation9 + $0x118] sm:$0xff] }
  0x95   : > { %951 = vmatpush1.bf16.msra.mxu0 %v3844_v22  ;;  %1004 = vmatpush1.bf16.msra.mxu1 %v3846_v10  ;;  %v576_v22 = vld [vmem:[#allocation9 + $0x90] sm:$0xff]  ;;  %v597_v7 = vld [vmem:[#allocation9 + $0x138] sm:$0xff] }
  0x96   : > { %952 = vmatprep.subr.bf16.mxu0 %v3837_v23  ;;  %v580_v23 = vld [vmem:[#allocation9 + $0xb0] sm:$0xff]  ;;  %1005 = vmatprep.subr.bf16.mxu1 %v3839_v17  ;;  %v3858_v10 = vcombine.low %v593_v6, %v597_v7  ;;  %v577_v15 = vld [vmem:[#allocation9 + $0x98] sm:$0xff] }
  0x97   : > { %v3841_v33 = vcombine.high %v576_v22, %v580_v23  ;;  %v3840_v37 = vcombine.low %v576_v22, %v580_v23  ;;  %v4473_v61 = vld [vmem:[#allocation7 + $0x24] ss:$16 sps:$4 sm:$0xff]   ;;  %v4471_v62 = vld [vmem:[#allocation7 + $0x20] ss:$16 sps:$4 sm:$0xff]   ;;  %v561_v23 = vld [vmem:[#allocation9 + $0x18] sm:$0xff] }
  0x98   : > { %v4476_v63 = vld [vmem:[#allocation7 + $0x4] ss:$16 sps:$4 sm:$0xff]   ;;  %v4474_v1 = vld [vmem:[#allocation7] ss:$16 sps:$4 sm:$0xff]   ;;  %v4482_v30 = vld [vmem:[#allocation7 + $0xcc] ss:$16 sps:$4 sm:$0xff]  }
  0x99   : > { %953 = vmatpush1.bf16.msra.mxu0 %v3836_v26  ;;  %1006 = vmatpush1.bf16.msra.mxu1 %v3838_v18  ;;  %v3830_v26 = vcombine.low %v567_v11, %v571_v12  ;;  %v585_v11 = vld [vmem:[#allocation9 + $0xd8] sm:$0xff] }
  0x9a   : > { %954 = vmatprep.subr.bf16.mxu0 %v3829_v27  ;;  %v617_v27 = vld [vmem:[#allocation9 + $0x1d8] sm:$0xff]  ;;  %1007 = vmatprep.subr.bf16.mxu1 %v3831_v24 }
  0x9b   : > { %v3883_v40 = vcombine.high %v617_v27, %v621_v28  ;;  %v3882_v42 = vcombine.low %v617_v27, %v621_v28  ;;  %v589_v12 = vld [vmem:[#allocation9 + $0xf8] sm:$0xff] }
  0x9c   : > { %v3850_v14 = vcombine.low %v585_v11, %v589_v12  ;;  %v565_v24 = vld [vmem:[#allocation9 + $0x38] sm:$0xff] }
  0x9d   : > { %955 = vmatpush1.bf16.msra.mxu0 %v3828_v34  ;;  %1008 = vmatpush1.bf16.msra.mxu1 %v3830_v26  ;;  %v3822_v34 = vcombine.low %v559_v19, %v563_v20  ;;  %v569_v19 = vld [vmem:[#allocation9 + $0x58] sm:$0xff]  ;;  %v3826_v26 = vcombine.low %v561_v23, %v565_v24 }
  0x9e   : > { %956 = vmatprep.subr.bf16.mxu0 %v3821_v38  ;;  %v560_v38 = vld [vmem:[#allocation9 + $0x10] sm:$0xff]  ;;  %1009 = vmatprep.subr.bf16.mxu1 %v3823_v32  ;;  %v573_v20 = vld [vmem:[#allocation9 + $0x78] sm:$0xff] }
  0x9f   : > { %v3825_v45 = vcombine.high %v560_v38, %v564_v39  ;;  %v3824_v48 = vcombine.low %v560_v38, %v564_v39  ;;  %v3835_v22 = vcombine.high %v569_v19, %v573_v20  ;;  %v4479_v27 = vld [vmem:[#allocation7 + $0xec] ss:$16 sps:$4 sm:$0xff]   ;;  %v4477_v28 = vld [vmem:[#allocation7 + $0xe8] ss:$16 sps:$4 sm:$0xff]  }
  0xa0   : > { %v4485_v31 = vld [vmem:[#allocation7 + $0xac] ss:$16 sps:$4 sm:$0xff]   ;;  %v4483_v32 = vld [vmem:[#allocation7 + $0xa8] ss:$16 sps:$4 sm:$0xff]  }
  0xa1   : > { %957 = vmatpush1.bf16.msra.mxu0 %v3820_v46  ;;  %1010 = vmatpush1.bf16.msra.mxu1 %v3822_v34  ;;  %v4455_v46 = vld [vmem:[#allocation7 + $0xe4] ss:$16 sps:$4 sm:$0xff]   ;;  %v4486_v34 = vld [vmem:[#allocation7 + $0x88] ss:$16 sps:$4 sm:$0xff]   ;;  %v4491_v35 = vld [vmem:[#allocation7 + $0x6c] ss:$16 sps:$4 sm:$0xff]  }
  0xa2   : > { %1048 = vmatprep.subr.bf16.mxu0 %v3881_v51  ;;  %1101 = vmatprep.subr.bf16.mxu1 %v3883_v40  ;;  %v4456_v51 = vld [vmem:[#allocation7 + $0xc0] ss:$16 sps:$4 sm:$0xff]   ;;  %v4489_v36 = vld [vmem:[#allocation7 + $0x68] ss:$16 sps:$4 sm:$0xff]   ;;  %v4497_v40 = vld [vmem:[#allocation7 + $0x2c] ss:$16 sps:$4 sm:$0xff]  }
  0xa3   : > { %v4492_v38 = vld [vmem:[#allocation7 + $0x48] ss:$16 sps:$4 sm:$0xff]  }
  0xa4   : > { %975 = vmatmul.mubr.bf16.vlgmr.msra.gmra.mxu0 %v5236_v53  ;;  %1028 = vmatmul.mubr.bf16.vlgmr.msra.gmra.mxu1 %v5236_v53  ;;  %v4495_v39 = vld [vmem:[#allocation7 + $0x28] ss:$16 sps:$4 sm:$0xff]  }
  0xa5   : > { %1049 = vmatpush1.bf16.msra.mxu0 %v3880_v57  ;;  %984 = vmatprep.mubr.bf16.mxu0 %v4975_v0  ;;  %v4467_v57 = vld [vmem:[#allocation7 + $0x64] ss:$16 sps:$4 sm:$0xff]  }
  0xa6   : > { %1050 = vmatprep.subr.bf16.mxu0 %v3873_v60  ;;  %1102 = vmatpush1.bf16.msra.mxu1 %v3882_v42  ;;  %v4468_v60 = vld [vmem:[#allocation7 + $0x40] ss:$16 sps:$4 sm:$0xff]   ;;  %v4498_v42 = vld [vmem:[#allocation7 + $0x8] ss:$16 sps:$4 sm:$0xff]  }
  0xa7   : > { %1037 = vmatprep.mubr.bf16.mxu1 %v4975_v0  ;;  %1103 = vmatprep.subr.bf16.mxu1 %v3875_v44 }
  0xa9   : > { %1051 = vmatpush1.bf16.msra.mxu0 %v3872_v2  ;;  %v601_v2 = vld [vmem:[#allocation9 + $0x158] sm:$0xff] }
  0xaa   : > { %1052 = vmatprep.subr.bf16.mxu0 %v3865_v8  ;;  %1104 = vmatpush1.bf16.msra.mxu1 %v3874_v47  ;;  %v3867_v4 = vcombine.high %v601_v2, %v605_v3  ;;  %v3866_v5 = vcombine.low %v601_v2, %v605_v3  ;;  %v3859_v8 = vcombine.high %v593_v6, %v597_v7 }
  0xac   : > { %985 = vmatmul.mubr.bf16.gmra.mxu0 %v5242_v9  ;;  %1038 = vmatmul.mubr.bf16.gmra.mxu1 %v5242_v9 }
  0xad   : > { %1053 = vmatpush1.bf16.msra.mxu0 %v3864_v13  ;;  %1080 = vmatprep.mubr.bf16.mxu0 %v4975_v0  ;;  %v3851_v13 = vcombine.high %v585_v11, %v589_v12 }
  0xae   : > { %1054 = vmatprep.subr.bf16.mxu0 %v3857_v16  ;;  %1133 = vmatprep.mubr.bf16.mxu1 %v4975_v0  ;;  %v581_v16 = vld [vmem:[#allocation9 + $0xb8] sm:$0xff] }
  0xaf   : > { %1105 = vmatprep.subr.bf16.mxu1 %v3867_v4  ;;  %v3843_v17 = vcombine.high %v577_v15, %v581_v16  ;;  %v3842_v18 = vcombine.low %v577_v15, %v581_v16 }
  0xb0   : > { %1106 = vmatpush1.bf16.msra.mxu1 %v3866_v5 }
  0xb1   : > { %1055 = vmatpush1.bf16.msra.mxu0 %v3856_v21  ;;  %1107 = vmatprep.subr.bf16.mxu1 %v3859_v8  ;;  %v3834_v21 = vcombine.low %v569_v19, %v573_v20 }
  0xb2   : > { %1056 = vmatprep.subr.bf16.mxu0 %v3849_v25  ;;  %v3827_v25 = vcombine.high %v561_v23, %v565_v24 }
  0xb4   : > { %1108 = vmatpush1.bf16.msra.mxu1 %v3858_v10 }
  0xb5   : > { %1057 = vmatpush1.bf16.msra.mxu0 %v3848_v29  ;;  %1109 = vmatprep.subr.bf16.mxu1 %v3851_v13  ;;  %v4480_v29 = vld [vmem:[#allocation7 + $0xc8] ss:$16 sps:$4 sm:$0xff]  }
  0xb6   : > { %1058 = vmatprep.subr.bf16.mxu0 %v3841_v33  ;;  %v4488_v33 = vld [vmem:[#allocation7 + $0x8c] ss:$16 sps:$4 sm:$0xff]  }
  0xb8   : > { %1110 = vmatpush1.bf16.msra.mxu1 %v3850_v14 }
  0xb9   : > { %1059 = vmatpush1.bf16.msra.mxu0 %v3840_v37  ;;  %1111 = vmatprep.subr.bf16.mxu1 %v3843_v17  ;;  %v4494_v37 = vld [vmem:[#allocation7 + $0x4c] ss:$16 sps:$4 sm:$0xff]  }
  0xba   : > { %1060 = vmatprep.subr.bf16.mxu0 %v3833_v41  ;;  %v4500_v41 = vld [vmem:[#allocation7 + $0xc] ss:$16 sps:$4 sm:$0xff]  }
  0xbc   : > { %1112 = vmatpush1.bf16.msra.mxu1 %v3842_v18 }
  0xbd   : > { %1061 = vmatpush1.bf16.msra.mxu0 %v3832_v43  ;;  %1113 = vmatprep.subr.bf16.mxu1 %v3835_v22 }
  0xbe   : > { %1062 = vmatprep.subr.bf16.mxu0 %v3825_v45 }
  0xc0   : > { %1114 = vmatpush1.bf16.msra.mxu1 %v3834_v21 }
  0xc1   : > { %1063 = vmatpush1.bf16.msra.mxu0 %v3824_v48  ;;  %1115 = vmatprep.subr.bf16.mxu1 %v3827_v25 }
  0xc2   : > { %1466 = vmatprep.subr.bf16.mxu0 %v4455_v46 }
  0xc4   : > { %1081 = vmatmul.mubr.bf16.vlgmr.msra.gmra.mxu0 %v5236_v53  ;;  %1116 = vmatpush1.bf16.msra.mxu1 %v3826_v26 }
  0xc5   : > { %1467 = vmatpush1.bf16.msra.mxu0 %v4453_v49  ;;  %1090 = vmatprep.mubr.bf16.mxu0 %v4975_v0 }
  0xc6   : > { %1468 = vmatprep.subr.bf16.mxu0 %v4458_v50  ;;  %1519 = vmatprep.subr.bf16.mxu1 %v4479_v27 }
  0xc7   : > { %1134 = vmatmul.mubr.bf16.vlgmr.msra.gmra.mxu1 %v5236_v53 }
  0xc8   : > { %1520 = vmatpush1.bf16.msra.mxu1 %v4477_v28  ;;  %1143 = vmatprep.mubr.bf16.mxu1 %v4975_v0 }
  0xc9   : > { %1469 = vmatpush1.bf16.msra.mxu0 %v4456_v51  ;;  %1521 = vmatprep.subr.bf16.mxu1 %v4482_v30 }
  0xca   : > { %1470 = vmatprep.subr.bf16.mxu0 %v4461_v52 }
  0xcc   : > { %1091 = vmatmul.mubr.bf16.gmra.mxu0 %v5242_v9  ;;  %1522 = vmatpush1.bf16.msra.mxu1 %v4480_v29 }
  0xcd   : > { %1471 = vmatpush1.bf16.msra.mxu0 %v4459_v54  ;;  %1498 = vmatprep.mubr.bf16.mxu0 %v4975_v0 }
  0xce   : > { %1472 = vmatprep.subr.bf16.mxu0 %v4464_v55  ;;  %1523 = vmatprep.subr.bf16.mxu1 %v4485_v31 }
  0xcf   : > { %1144 = vmatmul.mubr.bf16.gmra.mxu1 %v5242_v9 }
  0xd0   : > { %1524 = vmatpush1.bf16.msra.mxu1 %v4483_v32  ;;  %1551 = vmatprep.mubr.bf16.mxu1 %v4975_v0 }
  0xd1   : > { %1473 = vmatpush1.bf16.msra.mxu0 %v4462_v56  ;;  %1525 = vmatprep.subr.bf16.mxu1 %v4488_v33 }
  0xd2   : > { %1474 = vmatprep.subr.bf16.mxu0 %v4467_v57 }
  0xd4   : > { %1526 = vmatpush1.bf16.msra.mxu1 %v4486_v34 }
  0xd5   : > { %1475 = vmatpush1.bf16.msra.mxu0 %v4465_v58  ;;  %1527 = vmatprep.subr.bf16.mxu1 %v4491_v35 }
  0xd6   : > { %1476 = vmatprep.subr.bf16.mxu0 %v4470_v59 }
  0xd8   : > { %1528 = vmatpush1.bf16.msra.mxu1 %v4489_v36 }
  0xd9   : > { %1477 = vmatpush1.bf16.msra.mxu0 %v4468_v60  ;;  %1529 = vmatprep.subr.bf16.mxu1 %v4494_v37 }
  0xda   : > { %1478 = vmatprep.subr.bf16.mxu0 %v4473_v61 }
  0xdc   : > { %1530 = vmatpush1.bf16.msra.mxu1 %v4492_v38 }
  0xdd   : > { %1479 = vmatpush1.bf16.msra.mxu0 %v4471_v62  ;;  %1531 = vmatprep.subr.bf16.mxu1 %v4497_v40 }
  0xde   : > { %1480 = vmatprep.subr.bf16.mxu0 %v4476_v63 }
  0xe0   : > { %1532 = vmatpush1.bf16.msra.mxu1 %v4495_v39 }
  0xe1   : > { %1481 = vmatpush1.bf16.msra.mxu0 %v4474_v1  ;;  %1533 = vmatprep.subr.bf16.mxu1 %v4500_v41 }
  0xe4   : > { %1499 = vmatmul.mubr.bf16.vlgmr.msra.gmra.mxu0 %v5236_v53  ;;  %1534 = vmatpush1.bf16.msra.mxu1 %v4498_v42 }
  0xe5   : > { %1508 = vmatprep.mubr.bf16.mxu0 %v4975_v0 }
  0xe7   : > { %1552 = vmatmul.mubr.bf16.vlgmr.msra.gmra.mxu1 %v5236_v53 }
  0xe8   : > { %1561 = vmatprep.mubr.bf16.mxu1 %v4975_v0 }
  0xec   : > { %1509 = vmatmul.mubr.bf16.gmra.mxu0 %v5242_v9 }
  0xef   : > { %1562 = vmatmul.mubr.bf16.gmra.mxu1 %v5242_v9 }
 0x164   : > { %v976_v43 = vpop.f32.mrf.mxu0  ;;  %v1029_v37 = vpop.f32.mrf.mxu1 }
 0x166   : > { %v978_v44 = vpop.f32.mrf.mxu0  ;;  %v1031_v38 = vpop.f32.mrf.mxu1 }
 0x167   : > { %v4088_v45 = vpack.c.bf16 %v978_v44, %v976_v43  ;;  %v4089_v39 = vpack.c.bf16 %v1031_v38, %v1029_v37 }
 0x168   : > { %v980_v46 = vpop.f32.mrf.mxu0  ;;  %v1033_v40 = vpop.f32.mrf.mxu1 }
 0x169   : > { %1250 = vst [vmem:[#allocation2] sm:$0xff] %v4088_v45  ;;  %1251 = vst [vmem:[#allocation2 + $0x8] sm:$0xff] %v4089_v39 }
 0x16a   : > { %v982_v47 = vpop.f32.mrf.mxu0  ;;  %v1035_v41 = vpop.f32.mrf.mxu1 }
 0x16b   : > { %v4092_v48 = vpack.c.bf16 %v982_v47, %v980_v46  ;;  %v4093_v42 = vpack.c.bf16 %v1035_v41, %v1033_v40 }
 0x16c   : > { %v986_v49 = vpop.f32.mrf.mxu0  ;;  %v1039_v43 = vpop.f32.mrf.mxu1 }
 0x16d   : > { %1254 = vst [vmem:[#allocation2 + $0x20] sm:$0xff] %v4092_v48  ;;  %1255 = vst [vmem:[#allocation2 + $0x28] sm:$0xff] %v4093_v42 }
 0x16e   : > { %v988_v50 = vpop.f32.mrf.mxu0  ;;  %v1041_v44 = vpop.f32.mrf.mxu1 }
 0x16f   : > { %v4096_v51 = vpack.c.bf16 %v988_v50, %v986_v49  ;;  %v4097_v45 = vpack.c.bf16 %v1041_v44, %v1039_v43 }
 0x170   : > { %v990_v52 = vpop.f32.mrf.mxu0  ;;  %v1574_v58 = vld [vmem:[#allocation2] sm:$0xf]  ;;  %v1779_v33 = vld [vmem:[#allocation2 + $0x4] sm:$0xf]  ;;  %v1043_v46 = vpop.f32.mrf.mxu1 }
 0x171   : > { %1258 = vst [vmem:[#allocation2 + $0x40] sm:$0xff] %v4096_v51  ;;  %1259 = vst [vmem:[#allocation2 + $0x48] sm:$0xff] %v4097_v45 }
 0x172   : > { %v992_v54 = vpop.f32.mrf.mxu0  ;;  %v1045_v47 = vpop.f32.mrf.mxu1 }
 0x173   : > { %v4100_v55 = vpack.c.bf16 %v992_v54, %v990_v52  ;;  %v4101_v48 = vpack.c.bf16 %v1045_v47, %v1043_v46 }
 0x174   : > { %v1575_v57 = vld [vmem:[#allocation2 + $0x20] sm:$0xf]  ;;  %v1780_v30 = vld [vmem:[#allocation2 + $0x24] sm:$0xf] }
 0x175   : > { %1262 = vst [vmem:[#allocation2 + $0x60] sm:$0xff] %v4100_v55  ;;  %v3932_v59 = vcombine.low %v1574_v58, %v1575_v57  ;;  %v3942_v34 = vcombine.low %v1779_v33, %v1780_v30  ;;  %1263 = vst [vmem:[#allocation2 + $0x68] sm:$0xff] %v4101_v48 }
 0x178   : > { %v1576_v53 = vld [vmem:[#allocation2 + $0x40] sm:$0xf]  ;;  %v1781_v60 = vld [vmem:[#allocation2 + $0x44] sm:$0xf] }
 0x17c   : > { %v1577_v56 = vld [vmem:[#allocation2 + $0x60] sm:$0xf]  ;;  %v1782_v61 = vld [vmem:[#allocation2 + $0x64] sm:$0xf] }
 0x17d   : > { %v3933_v9 = vcombine.low %v1576_v53, %v1577_v56  ;;  %v3943_v63 = vcombine.low %v1781_v60, %v1782_v61 }
 0x17f   : > { %4265 = vmatprep.subr.bf16.mxu0 %v3933_v9 }
 0x180   : > { %4266 = vmatpush3.bf16.xpose.msra.mxu0 %v3933_v9 }
 0x181   : > { %4267 = vmatprep.subr.bf16.mxu0 %v3932_v59 }
 0x184   : > { %v1082_v62 = vpop.f32.mrf.mxu0 }
 0x186   : > { %v1084_v1 = vpop.f32.mrf.mxu0 }
 0x187   : > { %v4090_v2 = vpack.c.bf16 %v1084_v1, %v1082_v62  ;;  %v1135_v49 = vpop.f32.mrf.mxu1 }
 0x188   : > { %v1086_v3 = vpop.f32.mrf.mxu0  ;;  %4268 = vmatpush3.bf16.xpose.msra.mxu0 %v3932_v59 }
 0x189   : > { %1252 = vst [vmem:[#allocation2 + $0x10] sm:$0xff] %v4090_v2  ;;  %4281 = vmatprep.subr.bf16.mxu0 %v3943_v63  ;;  %v1137_v50 = vpop.f32.mrf.mxu1 }
 0x18a   : > { %v1088_v4 = vpop.f32.mrf.mxu0  ;;  %v4091_v51 = vpack.c.bf16 %v1137_v50, %v1135_v49 }
 0x18b   : > { %v4094_v5 = vpack.c.bf16 %v1088_v4, %v1086_v3  ;;  %v1139_v52 = vpop.f32.mrf.mxu1 }
 0x18c   : > { %v1092_v6 = vpop.f32.mrf.mxu0  ;;  %1253 = vst [vmem:[#allocation2 + $0x18] sm:$0xff] %v4091_v51 }
 0x18d   : > { %1256 = vst [vmem:[#allocation2 + $0x30] sm:$0xff] %v4094_v5  ;;  %v1141_v54 = vpop.f32.mrf.mxu1 }
 0x18e   : > { %v1094_v7 = vpop.f32.mrf.mxu0  ;;  %v4095_v55 = vpack.c.bf16 %v1141_v54, %v1139_v52 }
 0x18f   : > { %v4098_v8 = vpack.c.bf16 %v1094_v7, %v1092_v6  ;;  %v1145_v53 = vpop.f32.mrf.mxu1 }
 0x190   : > { %v1096_v10 = vpop.f32.mrf.mxu0  ;;  %v1578_v17 = vld [vmem:[#allocation2 + $0x10] sm:$0xf]  ;;  %1257 = vst [vmem:[#allocation2 + $0x38] sm:$0xff] %v4095_v55 }
 0x191   : > { %1260 = vst [vmem:[#allocation2 + $0x50] sm:$0xff] %v4098_v8  ;;  %v1147_v56 = vpop.f32.mrf.mxu1 }
 0x192   : > { %v1098_v11 = vpop.f32.mrf.mxu0  ;;  %v4099_v57 = vpack.c.bf16 %v1147_v56, %v1145_v53 }
 0x193   : > { %v4102_v12 = vpack.c.bf16 %v1098_v11, %v1096_v10  ;;  %v1149_v2 = vpop.f32.mrf.mxu1 }
 0x194   : > { %v1579_v15 = vld [vmem:[#allocation2 + $0x30] sm:$0xf]  ;;  %1261 = vst [vmem:[#allocation2 + $0x58] sm:$0xff] %v4099_v57  ;;  %v1784_v55 = vld [vmem:[#allocation2 + $0x34] sm:$0xf] }
 0x195   : > { %1264 = vst [vmem:[#allocation2 + $0x70] sm:$0xff] %v4102_v12  ;;  %v3934_v20 = vcombine.low %v1578_v17, %v1579_v15  ;;  %v1151_v3 = vpop.f32.mrf.mxu1  ;;  %v1987_v17 = vld [vmem:[#allocation2 + $0x18] sm:$0xf] }
 0x196   : > { %v4103_v4 = vpack.c.bf16 %v1151_v3, %v1149_v2 }
 0x198   : > { %v1580_v13 = vld [vmem:[#allocation2 + $0x50] sm:$0xf]  ;;  %v1785_v18 = vld [vmem:[#allocation2 + $0x54] sm:$0xf]  ;;  %1265 = vst [vmem:[#allocation2 + $0x78] sm:$0xff] %v4103_v4 }
 0x19c   : > { %v1581_v14 = vld [vmem:[#allocation2 + $0x70] sm:$0xf]  ;;  %v1786_v19 = vld [vmem:[#allocation2 + $0x74] sm:$0xf] }
 0x19d   : > { %v3935_v16 = vcombine.low %v1580_v13, %v1581_v14  ;;  %v5264_v21 = vcombine.low %v1785_v18, %v1786_v19  ;;  %v1989_v13 = vld [vmem:[#allocation2 + $0x58] sm:$0xf] }
 0x19e   : > { %v1988_v18 = vld [vmem:[#allocation2 + $0x38] sm:$0xf] }
 0x19f   : > { %4273 = vmatprep.subr.bf16.mxu1 %v3935_v16  ;;  %v1990_v14 = vld [vmem:[#allocation2 + $0x78] sm:$0xf]  ;;  %v3954_v19 = vcombine.low %v1987_v17, %v1988_v18  ;;  %v2191_v17 = vld [vmem:[#allocation2 + $0x1c] sm:$0xf] }
 0x1a0   : > { %4274 = vmatpush3.bf16.msra.mxu1 %v3935_v16  ;;  %v3955_v15 = vcombine.low %v1989_v13, %v1990_v14  ;;  %v2194_v13 = vld [vmem:[#allocation2 + $0x7c] sm:$0xf] }
 0x1a1   : > { %4275 = vmatprep.subr.bf16.mxu1 %v3934_v20  ;;  %v2192_v18 = vld [vmem:[#allocation2 + $0x3c] sm:$0xf] }
 0x1a4   : > { %v1500_v22 = vpop.f32.mrf.mxu0  ;;  %4276 = vmatpush3.bf16.msra.mxu1 %v3934_v20  ;;  %v2189_v20 = vld [vmem:[#allocation2 + $0x4c] sm:$0xf] }
 0x1a5   : > { %4289 = vmatprep.subr.bf16.mxu1 %v5264_v21 }
 0x1a6   : > { %v1502_v23 = vpop.f32.mrf.mxu0 }
 0x1a8   : > { %v1504_v24 = vpop.f32.mrf.mxu0 }
 0x1a9   : > { %v1572_v25 = vpack.c.bf16 %v1504_v24, %v1500_v22  ;;  %v2190_v22 = vld [vmem:[#allocation2 + $0x6c] sm:$0xf]  ;;  %v5284_v24 = vpop.f32.mrf.mxu1 }
 0x1aa   : > { %v1506_v26 = vpop.f32.mrf.mxu0 }
 0x1ab   : > { %4269 = vmatprep.mubr.bf16.mxu0 %v1572_v25  ;;  %v1777_v32 = vpack.c.bf16 %v1506_v26, %v1502_v23  ;;  %v5281_v23 = vcombine.low %v2189_v20, %v2190_v22  ;;  %v5286_v25 = vpop.f32.mrf.mxu1  ;;  %v3964_v20 = vcombine.low %v2191_v17, %v2192_v18 }
 0x1ac   : > { %v1510_v27 = vpop.f32.mrf.mxu0 }
 0x1ad   : > { %v5288_v26 = vpop.f32.mrf.mxu1 }
 0x1ae   : > { %v1512_v28 = vpop.f32.mrf.mxu0 }
 0x1b0   : > { %v1514_v29 = vpop.f32.mrf.mxu0 }
 0x1b1   : > { %v1573_v31 = vpack.c.bf16 %v1514_v29, %v1510_v27  ;;  %v5290_v27 = vpop.f32.mrf.mxu1 }
 0x1b2   : > { %v1516_v35 = vpop.f32.mrf.mxu0 }
 0x1b3   : > { %4270 = vmatmul.mubr.bf16.vlgmr.msra.gmra.mxu0 %v1573_v31  ;;  %v1778_v36 = vpack.c.bf16 %v1516_v35, %v1512_v28  ;;  %v2185_v28 = vpack.c.bf16 %v5290_v27, %v5286_v25 }
 0x1b4   : > { %4282 = vmatpush3.bf16.xpose.msra.mxu0 %v3943_v63  ;;  %4285 = vmatprep.mubr.bf16.mxu0 %v1777_v32 }
 0x1b5   : > { %4283 = vmatprep.subr.bf16.mxu0 %v3942_v34 }
 0x1bc   : > { %4284 = vmatpush3.bf16.xpose.msra.mxu0 %v3942_v34 }
 0x1bd   : > { %4305 = vmatprep.subr.bf16.mxu0 %v3955_v15 }
 0x1c3   : > { %4286 = vmatmul.mubr.bf16.vlgmr.msra.gmra.mxu0 %v1778_v36 }
 0x1c4   : > { %4306 = vmatpush3.bf16.msra.mxu0 %v3955_v15 }
 0x1c5   : > { %4307 = vmatprep.subr.bf16.mxu0 %v3954_v19 }
 0x1c8   : > { %4308 = vmatpush3.bf16.msra.mxu0 %v3954_v19 }
 0x1c9   : > { %4313 = vmatprep.subr.bf16.mxu0 %v5281_v23 }
 0x273   : > { %v4271_v9 = vpop.f32.mrf.mxu0 }
 0x274   : > { %v1650_v58 = vsel %vm1643_vm0, %v4271_v9, -inf }
 0x275   : > { %1651 = vmax.xlane.f32.xlu1 %v1650_v58  ;;  %v1628_v59 = vpop.f32.mrf.mxu0  ;;  %v1783_v58 = vld [vmem:[#allocation2 + $0x14] sm:$0xf] }
 0x276   : > { %v1644_v60 = vsel %vm1643_vm0, %v1628_v59, -inf }
 0x277   : > { %1645 = vmax.xlane.f32.xlu0 %v1644_v60  ;;  %v4272_v61 = vpop.f32.mrf.mxu0 }
 0x278   : > { %v1653_v62 = vsel %vm1643_vm0, %v4272_v61, -inf }
 0x279   : > { %1654 = vmax.xlane.f32.xlu1 %v1653_v62  ;;  %v1631_v63 = vpop.f32.mrf.mxu0  ;;  %v1986_v62 = vld [vmem:[#allocation2 + $0x68] sm:$0xf] }
 0x27a   : > { %v1647_v1 = vsel %vm1643_vm0, %v1631_v63, -inf }
 0x27b   : > { %1648 = vmax.xlane.f32.xlu0 %v1647_v1 }
 0x283   : > { %v5271_v5 = vpop.f32.mrf.mxu0 }
 0x284   : > { %v1854_v12 = vsel %vm1643_vm0, %v5271_v5, -inf }
 0x285   : > { %v1833_v6 = vpop.f32.mrf.mxu0 }
 0x286   : > { %v1848_v7 = vsel %vm1643_vm0, %v1833_v6, -inf }
 0x287   : > { %v5274_v8 = vpop.f32.mrf.mxu0  ;;  %1849 = vmax.xlane.f32.xlu0 %v1848_v7  ;;  %v1984_v7 = vld [vmem:[#allocation2 + $0x28] sm:$0xf] }
 0x288   : > { %v1857_v16 = vsel %vm1643_vm0, %v5274_v8, -inf }
 0x289   : > { %v1836_v10 = vpop.f32.mrf.mxu0 }
 0x28a   : > { %v1851_v11 = vsel %vm1643_vm0, %v1836_v10, -inf }
 0x28b   : > { %1852 = vmax.xlane.f32.xlu1 %v1851_v11  ;;  %1855 = vmax.xlane.f32.xlu0 %v1854_v12  ;;  %v1563_v11 = vpop.f32.mrf.mxu1  ;;  %v2193_v12 = vld [vmem:[#allocation2 + $0x5c] sm:$0xf] }
 0x28c   : > { %v3965_v14 = vcombine.low %v2193_v12, %v2194_v13 }
 0x28d   : > { %v5327_v15 = vpop.f32.mrf.mxu1 }
 0x28f   : > { %1858 = vmax.xlane.f32.xlu1 %v1857_v16  ;;  %v1567_v16 = vpop.f32.mrf.mxu1 }
 0x290   : > { %v1982_v19 = vpack.c.bf16 %v1567_v16, %v1563_v11 }
 0x291   : > { %v1569_v22 = vpop.f32.mrf.mxu1 }
 0x2fe   : > { %v1652_v29 = vpop.xlane.xlu1 %1651 }
 0x2ff   : > { %v1658_v32 = vsub.f32 %v4271_v9, %v1652_v29 }
 0x300   : > { %v1646_v30 = vpop.xlane.xlu0 %1645 }
 0x301   : > { %v1656_v31 = vsub.f32 %v1628_v59, %v1646_v30  ;;  %v1664_v39 = vmul.f32 1.442695, %v1658_v32  ;;  %v3944_v59 = vcombine.low %v1783_v58, %v1784_v55 }
 0x302   : > { %v1655_v33 = vpop.xlane.xlu1 %1654 }
 0x303   : > { %v1660_v34 = vmul.f32 1.442695, %v1656_v31  ;;  %v1659_v35 = vsub.f32 %v4272_v61, %v1655_v33  ;;  %v1985_v61 = vld [vmem:[#allocation2 + $0x48] sm:$0xf] }
 0x304   : > { %v1649_v36 = vpop.xlane.xlu0 %1648 }
 0x305   : > { %v1666_v37 = vmul.f32 1.442695, %v1659_v35  ;;  %v1657_v38 = vsub.f32 %v1631_v63, %v1649_v36  ;;  %4625 = vpow2.f32 %v1660_v34  ;;  %v3953_v63 = vcombine.low %v1985_v61, %v1986_v62 }
 0x307   : > { %v1662_v40 = vmul.f32 1.442695, %v1657_v38  ;;  %4627 = vpow2.f32 %v1666_v37 }
 0x309   : > { %4629 = vpow2.f32 %v1662_v40 }
 0x30a   : > { %4631 = vpow2.f32 %v1664_v39 }
 0x310   : > { %v1850_v41 = vpop.xlane.xlu0 %1849 }
 0x311   : > { %v1860_v42 = vsub.f32 %v1833_v6, %v1850_v41  ;;  %v1983_v6 = vld [vmem:[#allocation2 + $0x8] sm:$0xf] }
 0x312   : > { %v5294_v43 = vpop.eup %4625 }
 0x313   : > { %v1864_v44 = vmul.f32 1.442695, %v1860_v42  ;;  %v1668_v16 = vsel %vm1643_vm0, %v5294_v43, 0.0 }
 0x314   : > { %v1853_v45 = vpop.xlane.xlu1 %1852  ;;  %v1856_v46 = vpop.xlane.xlu0 %1855 }
 0x315   : > { %v5296_v47 = vpop.eup %4627  ;;  %v1861_v48 = vsub.f32 %v1836_v10, %v1853_v45  ;;  %v1862_v49 = vsub.f32 %v5271_v5, %v1856_v46  ;;  %4633 = vpow2.f32 %v1864_v44  ;;  %v1981_v5 = vpack.c.bf16 %v5288_v26, %v5284_v24 }
 0x316   : > { %v5299_v50 = vpop.eup %4629  ;;  %v3952_v10 = vcombine.low %v1983_v6, %v1984_v7  ;;  %v2186_v7 = vpack.c.bf16 %v1569_v22, %v5327_v15 }
 0x317   : > { %v5301_v51 = vpop.eup %4631  ;;  %v1866_v52 = vmul.f32 1.442695, %v1861_v48  ;;  %v1680_v54 = vpack.c.bf16 %v5299_v50, %v5294_v43  ;;  %v1868_v56 = vmul.f32 1.442695, %v1862_v49 }
 0x318   : > { %v1681_v53 = vpack.c.bf16 %v5296_v47, %v5301_v51  ;;  %v1859_v57 = vpop.xlane.xlu1 %1858  ;;  %v1674_v43 = vsel %vm1643_vm0, %v5301_v51, 0.0 }
 0x319   : > { %4635 = vpow2.f32 %v1866_v52  ;;  %v1863_v9 = vsub.f32 %v5274_v8, %v1859_v57  ;;  %4277 = vmatprep.mubr.msk.bf16.mxu1 %vm1643_vm0, %v1680_v54 }
 0x31a   : > { %4278 = vmatmul.mubr.msk.bf16.vlgmr.msra.gmra.mxu1 %vm1643_vm0, %v1681_v53  ;;  %4637 = vpow2.f32 %v1868_v56 }
 0x31b   : > { %v1870_v60 = vmul.f32 1.442695, %v1863_v9  ;;  %4290 = vmatpush3.bf16.msra.mxu1 %v5264_v21 }
 0x31c   : > { %4291 = vmatprep.subr.bf16.mxu1 %v3944_v59 }
 0x31d   : > { %4639 = vpow2.f32 %v1870_v60 }
 0x31f   : > { %4292 = vmatpush3.bf16.msra.mxu1 %v3944_v59 }
 0x320   : > { %4297 = vmatprep.subr.bf16.mxu1 %v3953_v63 }
 0x322   : > { %v5311_v1 = vpop.eup %4633 }
 0x323   : > { %v1872_v18 = vsel %vm1643_vm0, %v5311_v1, 0.0 }
 0x326   : > { %v5313_v2 = vpop.eup %4635 }
 0x327   : > { %v1884_v3 = vpack.c.bf16 %v5313_v2, %v5311_v1  ;;  %v5317_v4 = vpop.eup %4637  ;;  %v1875_v22 = vsel %vm1643_vm0, %v5313_v2, 0.0 }
 0x328   : > { %v1878_v1 = vsel %vm1643_vm0, %v5317_v4, 0.0 }
 0x329   : > { %4293 = vmatprep.mubr.msk.bf16.mxu1 %vm1643_vm0, %v1884_v3  ;;  %v2188_v3 = vld [vmem:[#allocation2 + $0x2c] sm:$0xf] }
 0x32a   : > { %v5320_v21 = vpop.eup %4639 }
 0x32b   : > { %v1885_v8 = vpack.c.bf16 %v5320_v21, %v5317_v4  ;;  %v1881_v2 = vsel %vm1643_vm0, %v5320_v21, 0.0 }
 0x32d   : > { %4294 = vmatmul.mubr.msk.bf16.vlgmr.msra.gmra.mxu1 %vm1643_vm0, %v1885_v8 }
 0x32e   : > { %4298 = vmatpush3.bf16.xpose.msra.mxu1 %v3953_v63  ;;  %4301 = vmatprep.mubr.bf16.mxu1 %v1981_v5  ;;  %v2187_v63 = vld [vmem:[#allocation2 + $0xc] sm:$0xf] }
 0x32f   : > { %4299 = vmatprep.subr.bf16.mxu1 %v3952_v10  ;;  %v3962_v6 = vcombine.low %v2187_v63, %v2188_v3 }
 0x336   : > { %4300 = vmatpush3.bf16.xpose.msra.mxu1 %v3952_v10 }
 0x337   : > { %4321 = vmatprep.subr.bf16.mxu1 %v3965_v14 }
 0x33d   : > { %4302 = vmatmul.mubr.bf16.vlgmr.msra.gmra.mxu1 %v1982_v19  ;;  %v1671_v19 = vsel %vm1643_vm0, %v5299_v50, 0.0  ;;  %v1677_v50 = vsel %vm1643_vm0, %v5296_v47, 0.0 }
 0x33e   : > { %4322 = vmatpush3.bf16.msra.mxu1 %v3965_v14 }
 0x33f   : > { %4323 = vmatprep.subr.bf16.mxu1 %v3964_v20 }
 0x342   : > { %4324 = vmatpush3.bf16.msra.mxu1 %v3964_v20 }
 0x3da   : > { %v5329_v24 = vpop.f32.mrf.mxu1 }
 0x3dc   : > { %v5331_v26 = vpop.f32.mrf.mxu1 }
 0x3de   : > { %v5333_v29 = vpop.f32.mrf.mxu1 }
 0x3e0   : > { %v5335_v30 = vpop.f32.mrf.mxu1 }
 0x3ed   : > { %v5337_v31 = vpop.f32.mrf.mxu1 }
 0x3ef   : > { %v5339_v32 = vpop.f32.mrf.mxu1 }
 0x3f1   : > { %v5341_v33 = vpop.f32.mrf.mxu1 }
 0x3f3   : > { %v5343_v34 = vpop.f32.mrf.mxu1 }
 0x3fd   : > { %v4303_v35 = vpop.f32.mrf.mxu1 }
 0x3fe   : > { %v2058_v40 = vsel %vm1643_vm0, %v4303_v35, -inf }
 0x3ff   : > { %v2037_v36 = vpop.f32.mrf.mxu1 }
 0x400   : > { %v2052_v37 = vsel %vm1643_vm0, %v2037_v36, -inf }
 0x401   : > { %2053 = vmax.xlane.f32.xlu0 %v2052_v37  ;;  %v4304_v38 = vpop.f32.mrf.mxu1 }
 0x402   : > { %v2061_v42 = vsel %vm1643_vm0, %v4304_v38, -inf }
 0x403   : > { %v2040_v39 = vpop.f32.mrf.mxu1 }
 0x404   : > { %v2055_v41 = vsel %vm1643_vm0, %v2040_v39, -inf }
 0x405   : > { %2059 = vmax.xlane.f32.xlu0 %v2058_v40  ;;  %2056 = vmax.xlane.f32.xlu1 %v2055_v41 }
 0x409   : > { %2062 = vmax.xlane.f32.xlu1 %v2061_v42 }
 0x48a   : > { %v2054_v44 = vpop.xlane.xlu0 %2053 }
 0x48b   : > { %v2064_v45 = vsub.f32 %v2037_v36, %v2054_v44  ;;  %v4501_v36 = vld [vmem:[#allocation10 + $0x78] sm:$0xff]  }
 0x48c   : > { %4153 = vmatprep.subr.bf16.mxu1 %v4501_v36 }
 0x48d   : > { %v2068_v49 = vmul.f32 1.442695, %v2064_v45 }
 0x48e   : > { %v2060_v46 = vpop.xlane.xlu0 %2059  ;;  %v2057_v48 = vpop.xlane.xlu1 %2056 }
 0x48f   : > { %v2066_v52 = vsub.f32 %v4303_v35, %v2060_v46  ;;  %v2065_v54 = vsub.f32 %v2040_v39, %v2057_v48  ;;  %4641 = vpow2.f32 %v2068_v49 }
 0x491   : > { %v2070_v55 = vmul.f32 1.442695, %v2065_v54  ;;  %v2072_v53 = vmul.f32 1.442695, %v2066_v52 }
 0x492   : > { %v2063_v56 = vpop.xlane.xlu1 %2062 }
 0x493   : > { %v2067_v57 = vsub.f32 %v4304_v38, %v2063_v56  ;;  %4643 = vpow2.f32 %v2070_v55 }
 0x494   : > { %4645 = vpow2.f32 %v2072_v53 }
 0x495   : > { %v2074_v9 = vmul.f32 1.442695, %v2067_v57 }
 0x497   : > { %4647 = vpow2.f32 %v2074_v9 }
 0x49c   : > { %v4642_v58 = vpop.eup %4641 }
 0x49d   : > { %v2076_v20 = vsel %vm1643_vm0, %v4642_v58, 0.0 }
 0x4a0   : > { %v4644_v59 = vpop.eup %4643 }
 0x4a1   : > { %v2088_v60 = vpack.c.bf16 %v4644_v59, %v4642_v58  ;;  %v5349_v61 = vpop.eup %4645  ;;  %v2079_v35 = vsel %vm1643_vm0, %v4644_v59, 0.0 }
 0x4a2   : > { %v2082_v59 = vsel %vm1643_vm0, %v5349_v61, 0.0 }
 0x4a3   : > { %4309 = vmatprep.mubr.msk.bf16.mxu0 %vm1643_vm0, %v2088_v60 }
 0x4a4   : > { %v5351_v62 = vpop.eup %4647 }
 0x4a5   : > { %v2089_v5 = vpack.c.bf16 %v5351_v62, %v5349_v61 }
 0x4a7   : > { %4310 = vmatmul.mubr.msk.bf16.vlgmr.msra.gmra.mxu0 %vm1643_vm0, %v2089_v5 }
 0x4a8   : > { %4314 = vmatpush3.bf16.xpose.msra.mxu0 %v5281_v23  ;;  %4317 = vmatprep.mubr.bf16.mxu0 %v2185_v28 }
 0x4a9   : > { %4315 = vmatprep.subr.bf16.mxu0 %v3962_v6 }
 0x4b0   : > { %4316 = vmatpush3.bf16.xpose.msra.mxu0 %v3962_v6 }
 0x4b7   : > { %4318 = vmatmul.mubr.bf16.vlgmr.msra.gmra.mxu0 %v2186_v7 }
 0x567   : > { %v5362_v8 = vpop.f32.mrf.mxu0 }
 0x569   : > { %v5364_v10 = vpop.f32.mrf.mxu0 }
 0x56b   : > { %v5366_v11 = vpop.f32.mrf.mxu0 }
 0x56d   : > { %v5368_v12 = vpop.f32.mrf.mxu0 }
 0x577   : > { %v4319_v13 = vpop.f32.mrf.mxu0 }
 0x578   : > { %v2262_v28 = vsel %vm1643_vm0, %v4319_v13, -inf }
 0x579   : > { %v2241_v14 = vpop.f32.mrf.mxu0 }
 0x57a   : > { %v2256_v23 = vsel %vm1643_vm0, %v2241_v14, -inf }
 0x57b   : > { %2257 = vmax.xlane.f32.xlu0 %v2256_v23  ;;  %v4320_v25 = vpop.f32.mrf.mxu0 }
 0x57c   : > { %v2265_v17 = vsel %vm1643_vm0, %v4320_v25, -inf }
 0x57d   : > { %v2244_v27 = vpop.f32.mrf.mxu0 }
 0x57e   : > { %v2259_v15 = vsel %vm1643_vm0, %v2244_v27, -inf }
 0x57f   : > { %2263 = vmax.xlane.f32.xlu0 %v2262_v28  ;;  %2260 = vmax.xlane.f32.xlu1 %v2259_v15  ;;  %v4503_v28 = vld [vmem:[#allocation10 + $0x70] sm:$0xff]  }
 0x583   : > { %1669 = vadd.xlane.f32.xlu0 %v1668_v16  ;;  %2266 = vmax.xlane.f32.xlu1 %v2265_v17 }
 0x587   : > { %1873 = vadd.xlane.f32.xlu0 %v1872_v18  ;;  %1672 = vadd.xlane.f32.xlu1 %v1671_v19 }
 0x58b   : > { %2077 = vadd.xlane.f32.xlu0 %v2076_v20  ;;  %1876 = vadd.xlane.f32.xlu1 %v1875_v22  ;;  %v4504_v22 = vld [vmem:[#allocation10 + $0x30] sm:$0xff]  }
 0x58f   : > { %1675 = vadd.xlane.f32.xlu0 %v1674_v43  ;;  %2080 = vadd.xlane.f32.xlu1 %v2079_v35 }
 0x593   : > { %1879 = vadd.xlane.f32.xlu0 %v1878_v1  ;;  %1678 = vadd.xlane.f32.xlu1 %v1677_v50  ;;  %v4505_v1 = vld [vmem:[#allocation10 + $0x68] sm:$0xff]  }
 0x597   : > { %1882 = vadd.xlane.f32.xlu1 %v1881_v2 }
 0x604   : > { %v2258_v37 = vpop.xlane.xlu0 %2257 }
 0x605   : > { %v2268_v51 = vsub.f32 %v2241_v14, %v2258_v37  ;;  %v4502_v14 = vld [vmem:[#allocation10 + $0x38] sm:$0xff]   ;;  %v4506_v37 = vld [vmem:[#allocation10 + $0x28] sm:$0xff]  }
 0x607   : > { %v2272_v38 = vmul.f32 1.442695, %v2268_v51 }
 0x608   : > { %v2264_v39 = vpop.xlane.xlu0 %2263  ;;  %v2261_v40 = vpop.xlane.xlu1 %2260 }
 0x609   : > { %4649 = vpow2.f32 %v2272_v38  ;;  %v2270_v41 = vsub.f32 %v4319_v13, %v2264_v39  ;;  %v2269_v42 = vsub.f32 %v2244_v27, %v2261_v40 }
 0x60b   : > { %v2276_v4 = vmul.f32 1.442695, %v2270_v41  ;;  %v2274_v44 = vmul.f32 1.442695, %v2269_v42  ;;  %v4508_v42 = vld [vmem:[#allocation10 + $0x20] sm:$0xff]  }
 0x60c   : > { %v1670_v45 = vpop.xlane.xlu0 %1669  ;;  %v2267_v47 = vpop.xlane.xlu1 %2266 }
 0x60d   : > { %4651 = vpow2.f32 %v2276_v4  ;;  %v2271_v46 = vsub.f32 %v4320_v25, %v2267_v47 }
 0x60e   : > { %4653 = vpow2.f32 %v2274_v44 }
 0x60f   : > { %4655 = vrcp.f32 %v1670_v45  ;;  %v2278_v21 = vmul.f32 1.442695, %v2271_v46  ;;  %v4509_v45 = vld [vmem:[#allocation10 + $0x58] sm:$0xff]  }
 0x610   : > { %v1874_v48 = vpop.xlane.xlu0 %1873  ;;  %v1673_v49 = vpop.xlane.xlu1 %1672 }
 0x611   : > { %4657 = vpow2.f32 %v2278_v21 }
 0x612   : > { %4659 = vrcp.f32 %v1874_v48  ;;  %v4510_v48 = vld [vmem:[#allocation10 + $0x18] sm:$0xff]  }
 0x613   : > { %4661 = vrcp.f32 %v1673_v49 }
 0x614   : > { %v2078_v52 = vpop.xlane.xlu0 %2077  ;;  %v1877_v54 = vpop.xlane.xlu1 %1876 }
 0x615   : > { %4663 = vrcp.f32 %v2078_v52  ;;  %v4514_v52 = vld [vmem:[#allocation10 + $0x50] sm:$0xff]  }
 0x616   : > { %v4650_v55 = vpop.eup %4649  ;;  %4665 = vrcp.f32 %v1877_v54 }
 0x617   : > { %v2280_v53 = vsel %vm1643_vm0, %v4650_v55, 0.0 }
 0x618   : > { %2281 = vadd.xlane.f32.xlu0 %v2280_v53  ;;  %v1676_v56 = vpop.xlane.xlu0 %1675  ;;  %v2081_v57 = vpop.xlane.xlu1 %2080  ;;  %v4518_v53 = vld [vmem:[#allocation10 + $0x40] sm:$0xff]  }
 0x619   : > { %4667 = vrcp.f32 %v1676_v56  ;;  %v4519_v56 = vld [vmem:[#allocation10] sm:$0xff]  }
 0x61a   : > { %v4652_v9 = vpop.eup %4651  ;;  %4669 = vrcp.f32 %v2081_v57  ;;  %v4523_v57 = vld [vmem:[#allocation10 + $0xf8] sm:$0xff]  }
 0x61b   : > { %v4654_v58 = vpop.eup %4653  ;;  %v2286_v61 = vsel %vm1643_vm0, %v4652_v9, 0.0  ;;  %4181 = vmatprep.subr.bf16.mxu0 %v4523_v57 }
 0x61c   : > { %v4656_v60 = vpop.eup %4655  ;;  %2083 = vadd.xlane.f32.xlu0 %v2082_v59  ;;  %v1880_v63 = vpop.xlane.xlu0 %1879  ;;  %v2283_v3 = vsel %vm1643_vm0, %v4654_v58, 0.0  ;;  %v2292_v6 = vpack.c.bf16 %v4654_v58, %v4650_v55  ;;  %v4516_v55 = vld [vmem:[#allocation10 + $0x48] sm:$0xff]  }
 0x61d   : > { %v1679_v5 = vpop.xlane.xlu1 %1678  ;;  %v1753_v7 = vmul.f32 %v4656_v60, %v5331_v26  ;;  %4671 = vrcp.f32 %v1880_v63  ;;  %2284 = vadd.xlane.f32.xlu1 %v2283_v3  ;;  %v2085_v26 = vsel %vm1643_vm0, %v5351_v62, 0.0  ;;  %v4526_v60 = vld [vmem:[#allocation10 + $0xb0] sm:$0xff]   ;;  %v4527_v63 = vld [vmem:[#allocation10 + $0xe8] sm:$0xff]  }
 0x61e   : > { %v4658_v13 = vpop.eup %4657  ;;  %4673 = vrcp.f32 %v1679_v5  ;;  %4325 = vmatprep.mubr.msk.bf16.mxu1 %vm1643_vm0, %v2292_v6  ;;  %v4528_v3 = vld [vmem:[#allocation10 + $0xa8] sm:$0xff]   ;;  %v4529_v6 = vld [vmem:[#allocation10 + $0xe0] sm:$0xff]  }
 0x61f   : > { %v4660_v23 = vpop.eup %4659  ;;  %v4104_v25 = vpack.c.bf16 %v1753_v7, %v1753_v7  ;;  %v2293_v27 = vpack.c.bf16 %v4658_v13, %v4652_v9  ;;  %v2289_v50 = vsel %vm1643_vm0, %v4658_v13, 0.0  ;;  %v4525_v9 = vld [vmem:[#allocation10 + $0xf0] sm:$0xff]   ;;  %v4530_v7 = vld [vmem:[#allocation10 + $0xa0] sm:$0xff]   ;;  %v4531_v13 = vld [vmem:[#allocation10 + $0xd8] sm:$0xff]  }
 0x620   : > { %v4662_v15 = vpop.eup %4661  ;;  %v1957_v16 = vmul.f32 %v4660_v23, %v5339_v32  ;;  %2287 = vadd.xlane.f32.xlu0 %v2286_v61  ;;  %v4533_v23 = vld [vmem:[#allocation10 + $0xd0] sm:$0xff]   ;;  %v4535_v61 = vld [vmem:[#allocation10 + $0xc8] sm:$0xff]  }
 0x621   : > { %v1883_v17 = vpop.xlane.xlu1 %1882  ;;  %1773 = vst [vmem:[#allocation3] sm:$0xf] %v4104_v25  ;;  %v1754_v18 = vmul.f32 %v4662_v15, %v5335_v30  ;;  %2086 = vadd.xlane.f32.xlu1 %v2085_v26  ;;  %4326 = vmatmul.mubr.msk.bf16.vlgmr.msra.gmra.mxu1 %vm1643_vm0, %v2293_v27  ;;  %v4534_v25 = vld [vmem:[#allocation10 + $0x90] sm:$0xff]   ;;  %v4536_v27 = vld [vmem:[#allocation10 + $0x88] sm:$0xff]   ;;  %v4538_v15 = vld [vmem:[#allocation10 + $0x80] sm:$0xff]  }
 0x622   : > { %4675 = vrcp.f32 %v1883_v17  ;;  %v4664_v19 = vpop.eup %4663  ;;  %v4108_v20 = vpack.c.bf16 %v1957_v16, %v1957_v16  ;;  %4154 = vmatpush3.bf16.msra.mxu1 %v4502_v14  ;;  %v4532_v14 = vld [vmem:[#allocation10 + $0x98] sm:$0xff]  }
 0x623   : > { %v4666_v43 = vpop.eup %4665  ;;  %v4105_v35 = vpack.c.bf16 %v1754_v18, %v1754_v18  ;;  %v2161_v32 = vmul.f32 %v4664_v19, %v5364_v10  ;;  %4155 = vmatprep.subr.bf16.mxu1 %v4503_v28  ;;  %v4507_v10 = vld [vmem:[#allocation10 + $0x60] sm:$0xff]  }
 0x624   : > { %1977 = vst [vmem:[#allocation3 + $0x4] sm:$0xf] %v4108_v20  ;;  %v1958_v62 = vmul.f32 %v4666_v43, %v5343_v34  ;;  %v4537_v28 = vld [vmem:[#allocation10 + $0xc0] sm:$0xff]  }
 0x625   : > { %1774 = vst [vmem:[#allocation3 + $0x10] sm:$0xf] %v4105_v35  ;;  %v4112_v30 = vpack.c.bf16 %v2161_v32, %v2161_v32  ;;  %2290 = vadd.xlane.f32.xlu1 %v2289_v50 }
 0x626   : > { %v4668_v2 = vpop.eup %4667  ;;  %v4109_v36 = vpack.c.bf16 %v1958_v62, %v1958_v62  ;;  %4156 = vmatpush3.bf16.msra.mxu1 %v4504_v22 }
 0x627   : > { %v4670_v51 = vpop.eup %4669  ;;  %2181 = vst [vmem:[#allocation3 + $0x8] sm:$0xf] %v4112_v30  ;;  %v1755_v38 = vmul.f32 %v4668_v2, %v5329_v24  ;;  %4157 = vmatprep.subr.bf16.mxu1 %v4505_v1 }
 0x628   : > { %1978 = vst [vmem:[#allocation3 + $0x14] sm:$0xf] %v4109_v36  ;;  %v2162_v39 = vmul.f32 %v4670_v51, %v5368_v12 }
 0x629   : > { %v4106_v40 = vpack.c.bf16 %v1755_v38, %v1755_v38 }
 0x62a   : > { %v4672_v34 = vpop.eup %4671  ;;  %v4113_v41 = vpack.c.bf16 %v2162_v39, %v2162_v39  ;;  %4158 = vmatpush3.bf16.msra.mxu1 %v4506_v37 }
 0x62b   : > { %v4674_v4 = vpop.eup %4673  ;;  %1775 = vst [vmem:[#allocation3 + $0x20] sm:$0xf] %v4106_v40  ;;  %v1959_v44 = vmul.f32 %v4672_v34, %v5337_v31  ;;  %4159 = vmatprep.subr.bf16.mxu1 %v4507_v10  ;;  %v4515_v31 = vld [vmem:[#allocation10 + $0x10] sm:$0xff]  }
 0x62c   : > { %2182 = vst [vmem:[#allocation3 + $0x18] sm:$0xf] %v4113_v41  ;;  %v1756_v47 = vmul.f32 %v4674_v4, %v5333_v29  ;;  %v4517_v29 = vld [vmem:[#allocation10 + $0x8] sm:$0xff]   ;;  %v4511_v58 = vld [vmem:[#allocation3] ss:$16 sps:$4 sm:$0xff]  }
 0x62d   : > { %v4110_v24 = vpack.c.bf16 %v1959_v44, %v1959_v44 }
 0x62e   : > { %v4107_v21 = vpack.c.bf16 %v1756_v47, %v1756_v47  ;;  %4160 = vmatpush3.bf16.msra.mxu1 %v4508_v42 }
 0x62f   : > { %v4676_v46 = vpop.eup %4675  ;;  %1979 = vst [vmem:[#allocation3 + $0x24] sm:$0xf] %v4110_v24  ;;  %4161 = vmatprep.subr.bf16.mxu1 %v4509_v45  ;;  %v4513_v49 = vld [vmem:[#allocation3 + $0x4] ss:$16 sps:$4 sm:$0xff]  }
 0x630   : > { %v1960_v12 = vmul.f32 %v4676_v46, %v5341_v33  ;;  %1776 = vst [vmem:[#allocation3 + $0x30] sm:$0xf] %v4107_v21  ;;  %2732 = vmatprep.mubr.bf16.mxu1 %v4513_v49  ;;  %v4524_v33 = vld [vmem:[#allocation10 + $0xb8] sm:$0xff]  }
 0x631   : > { %4182 = vmatpush3.bf16.msra.mxu0 %v4524_v33 }
 0x632   : > { %v4111_v54 = vpack.c.bf16 %v1960_v12, %v1960_v12  ;;  %4162 = vmatpush3.bf16.msra.mxu1 %v4510_v48  ;;  %4183 = vmatprep.subr.bf16.mxu0 %v4525_v9 }
 0x633   : > { %4163 = vmatprep.subr.bf16.mxu1 %v4514_v52  ;;  %v4539_v44 = vld [vmem:[#allocation3 + $0x8] ss:$16 sps:$4 sm:$0xff]  }
 0x634   : > { %1980 = vst [vmem:[#allocation3 + $0x34] sm:$0xf] %v4111_v54  ;;  %v3972_v54 = vld [vmem:[%s5539_s4] ss:$0 sm:$0xff] }
 0x635   : > { %4184 = vmatpush3.bf16.msra.mxu0 %v4526_v60 }
 0x636   : > { %4164 = vmatpush3.bf16.msra.mxu1 %v4515_v31  ;;  %4185 = vmatprep.subr.bf16.mxu0 %v4527_v63 }
 0x637   : > { %4165 = vmatprep.subr.bf16.mxu1 %v4516_v55  ;;  %v4522_v5 = vld [vmem:[#allocation3 + $0x20] ss:$16 sps:$4 sm:$0xff]  }
 0x639   : > { %4186 = vmatpush3.bf16.msra.mxu0 %v4528_v3 }
 0x63a   : > { %4166 = vmatpush3.bf16.msra.mxu1 %v4517_v29  ;;  %4187 = vmatprep.subr.bf16.mxu0 %v4529_v6 }
 0x63b   : > { %4167 = vmatprep.subr.bf16.mxu1 %v4518_v53  ;;  %v4520_v59 = vld [vmem:[#allocation3 + $0x24] ss:$16 sps:$4 sm:$0xff]  }
 0x63d   : > { %4188 = vmatpush3.bf16.msra.mxu0 %v4530_v7 }
 0x63e   : > { %4168 = vmatpush3.bf16.msra.mxu1 %v4519_v56  ;;  %4189 = vmatprep.subr.bf16.mxu0 %v4531_v13 }
 0x641   : > { %2733 = vmatmul.mubr.bf16.vlgmr.msra.gmra.mxu1 %v4511_v58  ;;  %4190 = vmatpush3.bf16.msra.mxu0 %v4532_v14 }
 0x642   : > { %2740 = vmatprep.mubr.bf16.mxu1 %v4520_v59  ;;  %4191 = vmatprep.subr.bf16.mxu0 %v4533_v23 }
 0x645   : > { %4192 = vmatpush3.bf16.msra.mxu0 %v4534_v25 }
 0x646   : > { %4193 = vmatprep.subr.bf16.mxu0 %v4535_v61 }
 0x649   : > { %2741 = vmatmul.mubr.bf16.gmra.mxu1 %v4522_v5  ;;  %4194 = vmatpush3.bf16.msra.mxu0 %v4536_v27  ;;  %v4705_v5 = vld [vmem:[%s5214_s23] sm:$0xff] }
 0x64a   : > { %3117 = vmatprep.mubr.bf16.mxu1 %v4975_v0  ;;  %4195 = vmatprep.subr.bf16.mxu0 %v4537_v28  ;;  %v4706_v28 = vld [vmem:[%s5214_s23 + $0x8] sm:$0xff] }
 0x64d   : > { %4196 = vmatpush3.bf16.msra.mxu0 %v4538_v15 }
 0x6a1   : > { %v2282_v16 = vpop.xlane.xlu0 %2281 }
 0x6a5   : > { %v2084_v17 = vpop.xlane.xlu0 %2083 }
 0x6a6   : > { %4677 = vrcp.f32 %v2084_v17  ;;  %v2285_v26 = vpop.xlane.xlu1 %2284 }
 0x6a9   : > { %v2288_v1 = vpop.xlane.xlu0 %2287 }
 0x6aa   : > { %v2087_v18 = vpop.xlane.xlu1 %2086 }
 0x6ab   : > { %4679 = vrcp.f32 %v2087_v18 }
 0x6ac   : > { %4681 = vrcp.f32 %v2288_v1  ;;  %v4545_v1 = vld [vmem:[#allocation12 + $0xe0] ss:$16 sps:$4 sm:$0xff]  }
 0x6ad   : > { %4683 = vrcp.f32 %v2282_v16 }
 0x6ae   : > { %v2291_v62 = vpop.xlane.xlu1 %2290 }
 0x6af   : > { %4685 = vrcp.f32 %v2291_v62  ;;  %v4547_v62 = vld [vmem:[#allocation12 + $0xe4] ss:$16 sps:$4 sm:$0xff]  }
 0x6b0   : > { %4687 = vrcp.f32 %v2285_v26  ;;  %3085 = vmatprep.subr.bf16.mxu1 %v4547_v62  ;;  %v4013_v62 = vld [vmem:[%s5540_s5] ss:$0 sm:$0xff] }
 0x6b1   : > { %3086 = vmatpush1.bf16.msra.mxu1 %v4545_v1 }
 0x6b3   : > { %v4678_v19 = vpop.eup %4677 }
 0x6b4   : > { %v2163_v20 = vmul.f32 %v4678_v19, %v5362_v8 }
 0x6b6   : > { %v4114_v22 = vpack.c.bf16 %v2163_v20, %v2163_v20  ;;  %v4707_v20 = vld [vmem:[%s5214_s23 + $0x10] sm:$0xff] }
 0x6b8   : > { %v4680_v43 = vpop.eup %4679  ;;  %2183 = vst [vmem:[#allocation3 + $0x28] sm:$0xf] %v4114_v22 }
 0x6b9   : > { %v2164_v35 = vmul.f32 %v4680_v43, %v5366_v11  ;;  %v4682_v50 = vpop.eup %4681 }
 0x6ba   : > { %v4684_v36 = vpop.eup %4683 }
 0x6bb   : > { %v4115_v32 = vpack.c.bf16 %v2164_v35, %v2164_v35  ;;  %v4708_v35 = vld [vmem:[%s5214_s23 + $0x18] sm:$0xff]  ;;  %s5587_s23 = sld [smem:[#allocation21_spill]] }
 0x6bc   : > { %v4686_v38 = vpop.eup %4685 }
 0x6bd   : > { %2184 = vst [vmem:[#allocation3 + $0x38] sm:$0xf] %v4115_v32  ;;  %v4688_v40 = vpop.eup %4687 }
 0x6c1   : > { %s4120_s15 = sshll.u32 %s5587_s23, 9 }
 0x6c2   : > { %s5485_s29 = scalar_lea.hbm %s5588_s18, %s4120_s15 }
 0x6c4   : > { %v4544_v24 = vld [vmem:[#allocation3 + $0x28] ss:$16 sps:$4 sm:$0xff]  }
 0x6e1   : > { %v4327_v30 = vpop.f32.mrf.mxu1 }
 0x6e2   : > { %v2367_v2 = vmul.f32 %v4682_v50, %v4327_v30  ;;  %v4548_v50 = vld [vmem:[#allocation12 + $0xe8] ss:$16 sps:$4 sm:$0xff]   ;;  %v4550_v30 = vld [vmem:[#allocation12 + $0xec] ss:$16 sps:$4 sm:$0xff]  }
 0x6e3   : > { %v2346_v37 = vpop.f32.mrf.mxu1  ;;  %3138 = vmatprep.subr.bf16.mxu0 %v4550_v30 }
 0x6e4   : > { %v4118_v51 = vpack.c.bf16 %v2367_v2, %v2367_v2  ;;  %v2365_v8 = vmul.f32 %v4684_v36, %v2346_v37 }
 0x6e5   : > { %v4328_v10 = vpop.f32.mrf.mxu1 }
 0x6e6   : > { %2387 = vst [vmem:[#allocation3 + $0x2c] sm:$0xf] %v4118_v51  ;;  %v4116_v39 = vpack.c.bf16 %v2365_v8, %v2365_v8  ;;  %v2368_v11 = vmul.f32 %v4686_v38, %v4328_v10 }
 0x6e7   : > { %v2349_v34 = vpop.f32.mrf.mxu1 }
 0x6e8   : > { %2385 = vst [vmem:[#allocation3 + $0xc] sm:$0xf] %v4116_v39  ;;  %v4119_v41 = vpack.c.bf16 %v2368_v11, %v2368_v11  ;;  %v2366_v42 = vmul.f32 %v4688_v40, %v2349_v34 }
 0x6ea   : > { %2388 = vst [vmem:[#allocation3 + $0x3c] sm:$0xf] %v4119_v41  ;;  %v4117_v4 = vpack.c.bf16 %v2366_v42, %v2366_v42 }
 0x6ec   : > { %2386 = vst [vmem:[#allocation3 + $0x1c] sm:$0xf] %v4117_v4 }
 0x6f1   : > { %v4542_v47 = vld [vmem:[#allocation3 + $0x2c] ss:$16 sps:$4 sm:$0xff]  }
 0x6f3   : > { %v4541_v45 = vld [vmem:[#allocation3 + $0xc] ss:$16 sps:$4 sm:$0xff]  }
 0x6f4   : > { %2781 = vmatprep.mubr.bf16.mxu0 %v4541_v45 }
 0x6f5   : > { %2782 = vmatmul.mubr.bf16.vlgmr.msra.gmra.mxu0 %v4539_v44 }
 0x6f6   : > { %2789 = vmatprep.mubr.bf16.mxu0 %v4542_v47  ;;  %3139 = vmatpush1.bf16.msra.mxu0 %v4548_v50  ;;  %v4553_v47 = vld [vmem:[#allocation12 + $0xc4] ss:$16 sps:$4 sm:$0xff]  }
 0x6f7   : > { %3087 = vmatprep.subr.bf16.mxu1 %v4553_v47 }
 0x6fd   : > { %2790 = vmatmul.mubr.bf16.gmra.mxu0 %v4544_v24  ;;  %v4556_v24 = vld [vmem:[#allocation12 + $0xcc] ss:$16 sps:$4 sm:$0xff]  }
 0x6fe   : > { %3170 = vmatprep.mubr.bf16.mxu0 %v4975_v0  ;;  %3140 = vmatprep.subr.bf16.mxu0 %v4556_v24 }
 0x701   : > { %v4169_v46 = vpop.f32.mrf.mxu1 }
 0x703   : > { %v4170_v21 = vpop.f32.mrf.mxu1 }
 0x704   : > { %v4171_v52 = vadd.f32 %v4170_v21, %v4169_v46  ;;  %v4551_v46 = vld [vmem:[#allocation12 + $0xc0] ss:$16 sps:$4 sm:$0xff]   ;;  %v4554_v21 = vld [vmem:[#allocation12 + $0xc8] ss:$16 sps:$4 sm:$0xff]  }
 0x705   : > { %v4172_v48 = vpop.f32.mrf.mxu1  ;;  %3088 = vmatpush1.bf16.msra.mxu1 %v4551_v46  ;;  %3141 = vmatpush1.bf16.msra.mxu0 %v4554_v21  ;;  %v4600_v46 = vld [vmem:[#allocation13 + $0xb0] sm:$0xff]   ;;  %v4601_v21 = vld [vmem:[#allocation13 + $0x68] sm:$0xff]  }
 0x706   : > { %v2735_v53 = vadd.f32 %v4171_v52, %v3972_v54  ;;  %v4560_v52 = vld [vmem:[#allocation12 + $0xa8] ss:$16 sps:$4 sm:$0xff]  }
 0x707   : > { %v4173_v12 = vpop.f32.mrf.mxu1 }
 0x708   : > { %v4174_v56 = vadd.f32 %v4173_v12, %v4172_v48  ;;  %v4559_v48 = vld [vmem:[#allocation12 + $0xa4] ss:$16 sps:$4 sm:$0xff]   ;;  %v4562_v12 = vld [vmem:[#allocation12 + $0xac] ss:$16 sps:$4 sm:$0xff]  }
 0x709   : > { %v4175_v49 = vpop.f32.mrf.mxu1  ;;  %3089 = vmatprep.subr.bf16.mxu1 %v4559_v48  ;;  %3142 = vmatprep.subr.bf16.mxu0 %v4562_v12  ;;  %v4602_v48 = vld [vmem:[#allocation13 + $0xe8] sm:$0xff]  }
 0x70a   : > { %v2738_v60 = vadd.f32 %v4174_v56, %v3972_v54  ;;  %3143 = vmatpush1.bf16.msra.mxu0 %v4560_v52  ;;  %v4574_v56 = vld [vmem:[#allocation12 + $0x6c] ss:$16 sps:$4 sm:$0xff]  }
 0x70b   : > { %v4176_v31 = vpop.f32.mrf.mxu1  ;;  %v4603_v52 = vld [vmem:[#allocation13 + $0x28] sm:$0xff]  }
 0x70c   : > { %v4177_v63 = vadd.f32 %v4176_v31, %v4175_v49  ;;  %v4557_v49 = vld [vmem:[#allocation12 + $0xa0] ss:$16 sps:$4 sm:$0xff]   ;;  %v4568_v31 = vld [vmem:[#allocation12 + $0x8c] ss:$16 sps:$4 sm:$0xff]  }
 0x70d   : > { %v4178_v33 = vpop.f32.mrf.mxu1  ;;  %3090 = vmatpush1.bf16.msra.mxu1 %v4557_v49  ;;  %3144 = vmatprep.subr.bf16.mxu0 %v4568_v31  ;;  %v4606_v31 = vld [vmem:[#allocation13 + $0xe0] sm:$0xff]  }
 0x70e   : > { %v2743_v25 = vadd.f32 %v4177_v63, %v3972_v54  ;;  %v4581_v63 = vld [vmem:[#allocation12 + $0x20] ss:$16 sps:$4 sm:$0xff]  }
 0x70f   : > { %v4179_v7 = vpop.f32.mrf.mxu1 }
 0x710   : > { %v4180_v61 = vadd.f32 %v4179_v7, %v4178_v33  ;;  %v4572_v33 = vld [vmem:[#allocation12 + $0x68] ss:$16 sps:$4 sm:$0xff]   ;;  %v4589_v7 = vld [vmem:[#allocation12 + $0x4] ss:$16 sps:$4 sm:$0xff]  }
 0x712   : > { %v2746_v18 = vadd.f32 %v4180_v61, %v3972_v54  ;;  %v4565_v54 = vld [vmem:[#allocation12 + $0x84] ss:$16 sps:$4 sm:$0xff]   ;;  %v4594_v61 = vld [vmem:[#allocation13 + $0xf8] sm:$0xff]  }
 0x713   : > { %3091 = vmatprep.subr.bf16.mxu1 %v4565_v54  ;;  %v4605_v54 = vld [vmem:[#allocation13 + $0x60] sm:$0xff]  }
 0x7b5   : > { %v4197_v55 = vpop.f32.mrf.mxu0 }
 0x7b7   : > { %v4198_v29 = vpop.f32.mrf.mxu0 }
 0x7b8   : > { %v4199_v57 = vadd.f32 %v4198_v29, %v4197_v55  ;;  %v4563_v55 = vld [vmem:[#allocation12 + $0x80] ss:$16 sps:$4 sm:$0xff]   ;;  %v4566_v29 = vld [vmem:[#allocation12 + $0x88] ss:$16 sps:$4 sm:$0xff]  }
 0x7b9   : > { %v4200_v9 = vpop.f32.mrf.mxu0  ;;  %3092 = vmatpush1.bf16.msra.mxu1 %v4563_v55  ;;  %3145 = vmatpush1.bf16.msra.mxu0 %v4566_v29  ;;  %v4607_v55 = vld [vmem:[#allocation13 + $0x20] sm:$0xff]  }
 0x7ba   : > { %v2784_v58 = vadd.f32 %v4199_v57, %v2735_v53  ;;  %v4571_v53 = vld [vmem:[#allocation12 + $0x64] ss:$16 sps:$4 sm:$0xff]   ;;  %v4569_v57 = vld [vmem:[#allocation12 + $0x60] ss:$16 sps:$4 sm:$0xff]   ;;  %3146 = vmatprep.subr.bf16.mxu0 %v4574_v56  ;;  %v4610_v56 = vld [vmem:[#allocation13 + $0xd8] sm:$0xff]  }
 0x7bb   : > { %v4201_v59 = vpop.f32.mrf.mxu0  ;;  %3093 = vmatprep.subr.bf16.mxu1 %v4571_v53  ;;  %v4608_v29 = vld [vmem:[#allocation13 + $0xa0] sm:$0xff]   ;;  %v4609_v53 = vld [vmem:[#allocation13 + $0x58] sm:$0xff]  }
 0x7bc   : > { %v4202_v3 = vadd.f32 %v4201_v59, %v4200_v9  ;;  %v2798_v6 = vadd.f32 %v4705_v5, %v2784_v58  ;;  %v4577_v9 = vld [vmem:[#allocation12 + $0x44] ss:$16 sps:$4 sm:$0xff]   ;;  %v4580_v58 = vld [vmem:[#allocation12 + $0x4c] ss:$16 sps:$4 sm:$0xff]   ;;  %v4575_v59 = vld [vmem:[#allocation12 + $0x40] ss:$16 sps:$4 sm:$0xff]  }
 0x7bd   : > { %v4203_v13 = vpop.f32.mrf.mxu0  ;;  %3094 = vmatpush1.bf16.msra.mxu1 %v4569_v57  ;;  %3147 = vmatpush1.bf16.msra.mxu0 %v4572_v33  ;;  %v4584_v5 = vld [vmem:[#allocation12 + $0x28] ss:$16 sps:$4 sm:$0xff]  }
 0x7be   : > { %v2787_v14 = vadd.f32 %v4202_v3, %v2738_v60  ;;  %2804 = vadd.xlane.f32.xlu0 %v2798_v6  ;;  %v4578_v60 = vld [vmem:[#allocation12 + $0x48] ss:$16 sps:$4 sm:$0xff]   ;;  %3095 = vmatprep.subr.bf16.mxu1 %v4577_v9  ;;  %v4583_v3 = vld [vmem:[#allocation12 + $0x24] ss:$16 sps:$4 sm:$0xff]  }
 0x7bf   : > { %v4204_v23 = vpop.f32.mrf.mxu0  ;;  %3148 = vmatprep.subr.bf16.mxu0 %v4580_v58  ;;  %v4611_v57 = vld [vmem:[#allocation13 + $0x18] sm:$0xff]   ;;  %v4613_v9 = vld [vmem:[#allocation13 + $0x50] sm:$0xff]  }
 0x7c0   : > { %v4205_v27 = vadd.f32 %v4204_v23, %v4203_v13  ;;  %v2799_v15 = vadd.f32 %v4706_v28, %v2787_v14  ;;  %v4592_v13 = vld [vmem:[#allocation12 + $0xc] ss:$16 sps:$4 sm:$0xff]   ;;  %v4587_v14 = vld [vmem:[#allocation12] ss:$16 sps:$4 sm:$0xff]   ;;  %v4590_v23 = vld [vmem:[#allocation12 + $0x8] ss:$16 sps:$4 sm:$0xff]  }
 0x7c1   : > { %v4206_v16 = vpop.f32.mrf.mxu0  ;;  %3096 = vmatpush1.bf16.msra.mxu1 %v4575_v59  ;;  %3149 = vmatpush1.bf16.msra.mxu0 %v4578_v60  ;;  %v4612_v33 = vld [vmem:[#allocation13 + $0x98] sm:$0xff]   ;;  %v4614_v58 = vld [vmem:[#allocation13 + $0xd0] sm:$0xff]  }
 0x7c2   : > { %v2792_v17 = vadd.f32 %v4205_v27, %v2743_v25  ;;  %2806 = vadd.xlane.f32.xlu1 %v2799_v15  ;;  %3097 = vmatprep.subr.bf16.mxu1 %v4583_v3  ;;  %v4593_v25 = vld [vmem:[#allocation13 + $0x78] sm:$0xff]   ;;  %v4615_v59 = vld [vmem:[#allocation13 + $0x10] sm:$0xff]   ;;  %v4618_v3 = vld [vmem:[#allocation13 + $0xc8] sm:$0xff]  }
 0x7c3   : > { %v4207_v26 = vpop.f32.mrf.mxu0  ;;  %v4616_v60 = vld [vmem:[#allocation13 + $0x90] sm:$0xff]  }
 0x7c4   : > { %v4208_v19 = vadd.f32 %v4207_v26, %v4206_v16  ;;  %v2800_v22 = vadd.f32 %v4707_v20, %v2792_v17 }
 0x7c5   : > { %3098 = vmatpush1.bf16.msra.mxu1 %v4581_v63  ;;  %v4617_v63 = vld [vmem:[#allocation13 + $0x48] sm:$0xff]  }
 0x7c6   : > { %v2795_v43 = vadd.f32 %v4208_v19, %v2746_v18  ;;  %2808 = vadd.xlane.f32.xlu0 %v2800_v22  ;;  %3099 = vmatprep.subr.bf16.mxu1 %v4589_v7  ;;  %v4621_v7 = vld [vmem:[#allocation13 + $0x40] sm:$0xff]  }
 0x7c8   : > { %v2801_v32 = vadd.f32 %v4708_v35, %v2795_v43 }
 0x7c9   : > { %3100 = vmatpush1.bf16.msra.mxu1 %v4587_v14  ;;  %v4623_v14 = vld [vmem:[#allocation13] sm:$0xff]  }
 0x7ca   : > { %2810 = vadd.xlane.f32.xlu1 %v2801_v32  ;;  %4209 = vmatprep.subr.bf16.mxu1 %v4593_v25  ;;  %v2905_v25 = vlaneseq }
 0x847   : > { %v2805_v2 = vpop.xlane.xlu0 %2804 }
 0x848   : > { %v2813_v36 = vmul.f32 0.0078125, %v2805_v2 }
 0x84a   : > { %v5423_v37 = vsub.f32 %v2798_v6, %v2813_v36  ;;  %v4586_v6 = vld [vmem:[#allocation12 + $0x2c] ss:$16 sps:$4 sm:$0xff]   ;;  %v4014_v36 = vld [vmem:[%s5541_s6] ss:$0 sm:$0xff] }
 0x84b   : > { %v2807_v51 = vpop.xlane.xlu1 %2806  ;;  %3150 = vmatprep.subr.bf16.mxu0 %v4586_v6  ;;  %v4620_v6 = vld [vmem:[#allocation13 + $0x88] sm:$0xff]  }
 0x84c   : > { %v2814_v8 = vmul.f32 0.0078125, %v2807_v51  ;;  %v2821_v38 = vmul.f32 %v5423_v37, %v5423_v37  ;;  %3151 = vmatpush1.bf16.msra.mxu0 %v4584_v5  ;;  %v4619_v5 = vld [vmem:[#allocation13 + $0x8] sm:$0xff]  }
 0x84d   : > { %3152 = vmatprep.subr.bf16.mxu0 %v4592_v13  ;;  %v4622_v13 = vld [vmem:[#allocation13 + $0xc0] sm:$0xff]  }
 0x84e   : > { %v5427_v10 = vsub.f32 %v2799_v15, %v2814_v8  ;;  %2825 = vadd.xlane.f32.xlu0 %v2821_v38 }
 0x84f   : > { %v2809_v39 = vpop.xlane.xlu0 %2808 }
 0x850   : > { %v2815_v11 = vmul.f32 0.0078125, %v2809_v39  ;;  %v2822_v40 = vmul.f32 %v5427_v10, %v5427_v10  ;;  %3153 = vmatpush1.bf16.msra.mxu0 %v4590_v23  ;;  %v4624_v23 = vld [vmem:[#allocation13 + $0x80] sm:$0xff]  }
 0x851   : > { %4237 = vmatprep.subr.bf16.mxu0 %v4594_v61  ;;  %v2906_v61 = vshrl.u32 %v2905_v25, 7 }
 0x852   : > { %v5431_v34 = vsub.f32 %v2800_v22, %v2815_v11  ;;  %2827 = vadd.xlane.f32.xlu1 %v2822_v40  ;;  %v4595_v40 = vld [vmem:[#allocation13 + $0x38] sm:$0xff]  }
 0x853   : > { %v2811_v41 = vpop.xlane.xlu1 %2810 }
 0x854   : > { %v2816_v42 = vmul.f32 0.0078125, %v2811_v41  ;;  %v2823_v4 = vmul.f32 %v5431_v34, %v5431_v34  ;;  %v4596_v41 = vld [vmem:[#allocation13 + $0xb8] sm:$0xff]  }
 0x856   : > { %v5435_v44 = vsub.f32 %v2801_v32, %v2816_v42  ;;  %2829 = vadd.xlane.f32.xlu0 %v2823_v4  ;;  %v4598_v4 = vld [vmem:[#allocation13 + $0xf0] sm:$0xff]  }
 0x858   : > { %v2824_v45 = vmul.f32 %v5435_v44, %v5435_v44 }
 0x85a   : > { %2831 = vadd.xlane.f32.xlu1 %v2824_v45 }
 0x8d7   : > { %v2826_v27 = vpop.xlane.xlu0 %2825 }
 0x8d8   : > { %v2833_v28 = vmul.f32 0.0078125, %v2826_v27  ;;  %v2911_v27 = vsub.s32 1, %v2906_v61 }
 0x8da   : > { %v2837_v15 = vadd.f32 1e-05, %v2833_v28  ;;  %v2919_v28 = vsub.s32 3, %v2906_v61 }
 0x8db   : > { %v2828_v16 = vpop.xlane.xlu1 %2827 }
 0x8dc   : > { %4689 = vrsqrt.f32 %v2837_v15  ;;  %v2834_v17 = vmul.f32 0.0078125, %v2828_v16  ;;  %v2907_v15 = vsub.s32 0, %v2906_v61  ;;  %v2915_v16 = vsub.s32 2, %v2906_v61 }
 0x8de   : > { %v2838_v26 = vadd.f32 1e-05, %v2834_v17  ;;  %v2903_v17 = vld [vmem:[%s5543_s8] sm:$0xf] }
 0x8df   : > { %v2830_v18 = vpop.xlane.xlu0 %2829 }
 0x8e0   : > { %4691 = vrsqrt.f32 %v2838_v26  ;;  %v2835_v19 = vmul.f32 0.0078125, %v2830_v18 }
 0x8e2   : > { %v2839_v20 = vadd.f32 1e-05, %v2835_v19  ;;  %v2912_v19 = vrot.slane %v2903_v17, %v2911_v27 }
 0x8e3   : > { %v2832_v22 = vpop.xlane.xlu1 %2831 }
 0x8e4   : > { %4693 = vrsqrt.f32 %v2839_v20  ;;  %v2836_v43 = vmul.f32 0.0078125, %v2832_v22  ;;  %v2920_v20 = vrot.slane %v2903_v17, %v2919_v28  ;;  %v2908_v22 = vrot.slane %v2903_v17, %v2907_v15 }
 0x8e6   : > { %v2840_v35 = vadd.f32 1e-05, %v2836_v43  ;;  %v2916_v43 = vrot.slane %v2903_v17, %v2915_v16 }
 0x8e8   : > { %4695 = vrsqrt.f32 %v2840_v35 }
 0x8e9   : > { %v4690_v32 = vpop.eup %4689 }
 0x8ea   : > { %v2845_v1 = vmul.f32 %v4690_v32, %v5423_v37 }
 0x8ec   : > { %v2855_v2 = vmul.f32 %v4013_v62, %v2845_v1 }
 0x8ed   : > { %v4692_v50 = vpop.eup %4691 }
 0x8ee   : > { %v2846_v30 = vmul.f32 %v4692_v50, %v5427_v10  ;;  %v5447_v38 = vadd.f32 %v4014_v36, %v2855_v2  ;;  %v4597_v10 = vld [vmem:[#allocation13 + $0x70] sm:$0xff]  }
 0x8f0   : > { %v2856_v51 = vmul.f32 %v4013_v62, %v2846_v30 }
 0x8f1   : > { %v4694_v8 = vpop.eup %4693 }
 0x8f2   : > { %v5449_v39 = vadd.f32 %v4014_v36, %v2856_v51  ;;  %v2847_v37 = vmul.f32 %v4694_v8, %v5431_v34  ;;  %v4599_v34 = vld [vmem:[#allocation13 + $0x30] sm:$0xff]  }
 0x8f4   : > { %v2869_v11 = vpack.c.bf16 %v5449_v39, %v5447_v38  ;;  %v2857_v47 = vmul.f32 %v4013_v62, %v2847_v37 }
 0x8f5   : > { %v4696_v42 = vpop.eup %4695 }
 0x8f6   : > { %3118 = vmatmul.mubr.bf16.vlgmr.msra.gmra.mxu1 %v2869_v11  ;;  %3171 = vmatmul.mubr.bf16.vlgmr.msra.gmra.mxu0 %v2869_v11  ;;  %v2848_v45 = vmul.f32 %v4696_v42, %v5435_v44  ;;  %v5457_v12 = vadd.f32 %v4014_v36, %v2857_v47 }
 0x8f7   : > { %3127 = vmatprep.mubr.bf16.mxu1 %v4975_v0  ;;  %3180 = vmatprep.mubr.bf16.mxu0 %v4975_v0  ;;  %v4604_v0 = vld [vmem:[#allocation13 + $0xa8] sm:$0xff]  }
 0x8f8   : > { %v2858_v24 = vmul.f32 %v4013_v62, %v2848_v45  ;;  %4210 = vmatpush3.bf16.msra.mxu1 %v4595_v40  ;;  %4238 = vmatpush3.bf16.msra.mxu0 %v4596_v41 }
 0x8f9   : > { %4211 = vmatprep.subr.bf16.mxu1 %v4597_v10  ;;  %4239 = vmatprep.subr.bf16.mxu0 %v4598_v4 }
 0x8fa   : > { %v5459_v49 = vadd.f32 %v4014_v36, %v2858_v24 }
 0x8fc   : > { %v2870_v44 = vpack.c.bf16 %v5459_v49, %v5457_v12  ;;  %4212 = vmatpush3.bf16.msra.mxu1 %v4599_v34  ;;  %4240 = vmatpush3.bf16.msra.mxu0 %v4600_v46 }
 0x8fd   : > { %4213 = vmatprep.subr.bf16.mxu1 %v4601_v21  ;;  %4241 = vmatprep.subr.bf16.mxu0 %v4602_v48 }
 0x8fe   : > { %3128 = vmatmul.mubr.bf16.gmra.mxu1 %v2870_v44  ;;  %3181 = vmatmul.mubr.bf16.gmra.mxu0 %v2870_v44 }
 0x900   : > { %4214 = vmatpush3.bf16.msra.mxu1 %v4603_v52  ;;  %4242 = vmatpush3.bf16.msra.mxu0 %v4604_v0 }
 0x901   : > { %4215 = vmatprep.subr.bf16.mxu1 %v4605_v54  ;;  %4243 = vmatprep.subr.bf16.mxu0 %v4606_v31 }
 0x904   : > { %4216 = vmatpush3.bf16.msra.mxu1 %v4607_v55  ;;  %4244 = vmatpush3.bf16.msra.mxu0 %v4608_v29 }
 0x905   : > { %4217 = vmatprep.subr.bf16.mxu1 %v4609_v53  ;;  %4245 = vmatprep.subr.bf16.mxu0 %v4610_v56 }
 0x908   : > { %4218 = vmatpush3.bf16.msra.mxu1 %v4611_v57  ;;  %4246 = vmatpush3.bf16.msra.mxu0 %v4612_v33 }
 0x909   : > { %4219 = vmatprep.subr.bf16.mxu1 %v4613_v9  ;;  %4247 = vmatprep.subr.bf16.mxu0 %v4614_v58 }
 0x90c   : > { %4220 = vmatpush3.bf16.msra.mxu1 %v4615_v59  ;;  %4248 = vmatpush3.bf16.msra.mxu0 %v4616_v60 }
 0x90d   : > { %4221 = vmatprep.subr.bf16.mxu1 %v4617_v63  ;;  %4249 = vmatprep.subr.bf16.mxu0 %v4618_v3 }
 0x910   : > { %4222 = vmatpush3.bf16.msra.mxu1 %v4619_v5  ;;  %4250 = vmatpush3.bf16.msra.mxu0 %v4620_v6 }
 0x911   : > { %4223 = vmatprep.subr.bf16.mxu1 %v4621_v7  ;;  %4251 = vmatprep.subr.bf16.mxu0 %v4622_v13 }
 0x914   : > { %4224 = vmatpush3.bf16.msra.mxu1 %v4623_v14  ;;  %4252 = vmatpush3.bf16.msra.mxu0 %v4624_v23 }
 0x9b6   : > { %v3119_v26 = vpop.f32.mrf.mxu1  ;;  %v3172_v18 = vpop.f32.mrf.mxu0 }
 0x9b7   : > { %v3120_v51 = vadd.f32 %v3119_v26, %v2908_v22  ;;  %v3173_v8 = vadd.f32 %v3172_v18, %v2916_v43 }
 0x9b8   : > { %v3121_v35 = vpop.f32.mrf.mxu1  ;;  %v3174_v32 = vpop.f32.mrf.mxu0 }
 0x9b9   : > { %v3122_v50 = vadd.f32 %v3121_v35, %v2912_v19  ;;  %v3175_v30 = vadd.f32 %v3174_v32, %v2920_v20  ;;  %v3191_v21 = vmax.f32 %v3120_v51, 0.0  ;;  %v3193_v48 = vmax.f32 %v3173_v8, 0.0 }
 0x9ba   : > { %v3123_v1 = vpop.f32.mrf.mxu1  ;;  %v3176_v62 = vpop.f32.mrf.mxu0 }
 0x9bb   : > { %v3124_v2 = vadd.f32 %v3123_v1, %v2908_v22  ;;  %v3177_v36 = vadd.f32 %v3176_v62, %v2916_v43  ;;  %v3192_v47 = vmax.f32 %v3122_v50, 0.0  ;;  %v3194_v24 = vmax.f32 %v3175_v30, 0.0 }
 0x9bc   : > { %v3125_v37 = vpop.f32.mrf.mxu1  ;;  %v3178_v11 = vpop.f32.mrf.mxu0 }
 0x9bd   : > { %v3126_v40 = vadd.f32 %v3125_v37, %v2912_v19  ;;  %v3179_v41 = vadd.f32 %v3178_v11, %v2920_v20  ;;  %v3195_v42 = vmax.f32 %v3124_v2, 0.0  ;;  %v3197_v10 = vmax.f32 %v3177_v36, 0.0 }
 0x9be   : > { %v3129_v4 = vpop.f32.mrf.mxu1  ;;  %v3182_v45 = vpop.f32.mrf.mxu0 }
 0x9bf   : > { %v3196_v34 = vmax.f32 %v3126_v40, 0.0  ;;  %v3198_v46 = vmax.f32 %v3179_v41, 0.0  ;;  %v3207_v31 = vpack.c.bf16 %v3195_v42, %v3191_v21  ;;  %v3209_v55 = vpack.c.bf16 %v3197_v10, %v3193_v48 }
 0x9c0   : > { %v3131_v44 = vpop.f32.mrf.mxu1  ;;  %v3184_v52 = vpop.f32.mrf.mxu0  ;;  %v3130_v58 = vadd.f32 %v3129_v4, %v2908_v22  ;;  %v3183_v59 = vadd.f32 %v3182_v45, %v2916_v43 }
 0x9c1   : > { %v3208_v0 = vpack.c.bf16 %v3196_v34, %v3192_v47  ;;  %v3210_v54 = vpack.c.bf16 %v3198_v46, %v3194_v24  ;;  %v3132_v29 = vadd.f32 %v3131_v44, %v2912_v19  ;;  %v3185_v57 = vadd.f32 %v3184_v52, %v2920_v20 }
 0x9c2   : > { %v3133_v53 = vpop.f32.mrf.mxu1  ;;  %v3186_v56 = vpop.f32.mrf.mxu0  ;;  %v3199_v61 = vmax.f32 %v3130_v58, 0.0  ;;  %v3201_v27 = vmax.f32 %v3183_v59, 0.0 }
 0x9c3   : > { %v3134_v33 = vadd.f32 %v3133_v53, %v2908_v22  ;;  %v3187_v9 = vadd.f32 %v3186_v56, %v2916_v43  ;;  %3510 = vmatprep.mubr.bf16.mxu1 %v3208_v0  ;;  %3559 = vmatprep.mubr.bf16.mxu0 %v3210_v54  ;;  %v3200_v13 = vmax.f32 %v3132_v29, 0.0  ;;  %v3202_v14 = vmax.f32 %v3185_v57, 0.0 }
 0x9c4   : > { %v3135_v60 = vpop.f32.mrf.mxu1  ;;  %v3188_v63 = vpop.f32.mrf.mxu0  ;;  %3511 = vmatmul.mubr.bf16.vlgmr.msra.gmra.mxu1 %v3207_v31  ;;  %3560 = vmatmul.mubr.bf16.vlgmr.msra.gmra.mxu0 %v3209_v55 }
 0x9c5   : > { %v3136_v3 = vadd.f32 %v3135_v60, %v2912_v19  ;;  %v3189_v5 = vadd.f32 %v3188_v63, %v2920_v20  ;;  %v3203_v6 = vmax.f32 %v3134_v33, 0.0  ;;  %v3205_v7 = vmax.f32 %v3187_v9, 0.0  ;;  %v4047_v19 = vld [vmem:[%s5545_s10] ss:$0 sm:$0xff] }
 0x9c7   : > { %v3204_v23 = vmax.f32 %v3136_v3, 0.0  ;;  %v3206_v25 = vmax.f32 %v3189_v5, 0.0  ;;  %v3211_v16 = vpack.c.bf16 %v3203_v6, %v3199_v61  ;;  %v3213_v17 = vpack.c.bf16 %v3205_v7, %v3201_v27 }
 0x9c9   : > { %v3212_v28 = vpack.c.bf16 %v3204_v23, %v3200_v13  ;;  %v3214_v15 = vpack.c.bf16 %v3206_v25, %v3202_v14 }
 0x9cb   : > { %3518 = vmatprep.mubr.bf16.mxu1 %v3212_v28  ;;  %3567 = vmatprep.mubr.bf16.mxu0 %v3214_v15 }
 0x9cc   : > { %3519 = vmatmul.mubr.bf16.gmra.mxu1 %v3211_v16  ;;  %3568 = vmatmul.mubr.bf16.gmra.mxu0 %v3213_v17 }
 0xa84   : > { %v4225_v26 = vpop.f32.mrf.mxu1  ;;  %v4253_v18 = vpop.f32.mrf.mxu0 }
 0xa86   : > { %v4226_v20 = vpop.f32.mrf.mxu1  ;;  %v4254_v22 = vpop.f32.mrf.mxu0 }
 0xa87   : > { %v4227_v43 = vadd.f32 %v4226_v20, %v4225_v26  ;;  %v4255_v62 = vadd.f32 %v4254_v22, %v4253_v18  ;;  %v4081_v22 = vld [vmem:[%s5547_s12] ss:$0 sm:$0xff] }
 0xa88   : > { %v4228_v35 = vpop.f32.mrf.mxu1  ;;  %v4256_v32 = vpop.f32.mrf.mxu0 }
 0xa89   : > { %v3513_v1 = vadd.f32 %v4227_v43, %v4047_v19 }
 0xa8a   : > { %v4229_v50 = vpop.f32.mrf.mxu1  ;;  %v4257_v30 = vpop.f32.mrf.mxu0 }
 0xa8b   : > { %v3562_v2 = vadd.f32 %v4255_v62, %v3513_v1  ;;  %v4230_v36 = vadd.f32 %v4229_v50, %v4228_v35  ;;  %v4258_v11 = vadd.f32 %v4257_v30, %v4256_v32 }
 0xa8c   : > { %v4231_v51 = vpop.f32.mrf.mxu1  ;;  %v4259_v8 = vpop.f32.mrf.mxu0 }
 0xa8d   : > { %v3516_v37 = vadd.f32 %v4230_v36, %v4047_v19  ;;  %v3576_v40 = vadd.f32 %v3562_v2, %v5447_v38 }
 0xa8e   : > { %v4232_v41 = vpop.f32.mrf.mxu1  ;;  %v4260_v42 = vpop.f32.mrf.mxu0 }
 0xa8f   : > { %v3565_v10 = vadd.f32 %v4258_v11, %v3516_v37  ;;  %v4233_v4 = vadd.f32 %v4232_v41, %v4231_v51  ;;  %3582 = vadd.xlane.f32.xlu0 %v3576_v40  ;;  %v4261_v34 = vadd.f32 %v4260_v42, %v4259_v8 }
 0xa90   : > { %v4234_v45 = vpop.f32.mrf.mxu1  ;;  %v4262_v47 = vpop.f32.mrf.mxu0 }
 0xa91   : > { %v3521_v24 = vadd.f32 %v4233_v4, %v4047_v19  ;;  %v3577_v46 = vadd.f32 %v3565_v10, %v5449_v39 }
 0xa92   : > { %v4235_v21 = vpop.f32.mrf.mxu1  ;;  %v4263_v48 = vpop.f32.mrf.mxu0 }
 0xa93   : > { %v3570_v44 = vadd.f32 %v4261_v34, %v3521_v24  ;;  %v4236_v52 = vadd.f32 %v4235_v21, %v4234_v45  ;;  %3584 = vadd.xlane.f32.xlu1 %v3577_v46  ;;  %v4264_v54 = vadd.f32 %v4263_v48, %v4262_v47 }
 0xa95   : > { %v3524_v0 = vadd.f32 %v4236_v52, %v4047_v19  ;;  %v3578_v38 = vadd.f32 %v3570_v44, %v5457_v12  ;;  %v4080_v19 = vld [vmem:[%s5546_s11] ss:$0 sm:$0xff] }
 0xa97   : > { %v3573_v31 = vadd.f32 %v4264_v54, %v3524_v0  ;;  %3586 = vadd.xlane.f32.xlu0 %v3578_v38 }
 0xa99   : > { %v3579_v55 = vadd.f32 %v3573_v31, %v5459_v49 }
 0xa9b   : > { %3588 = vadd.xlane.f32.xlu1 %v3579_v55 }
 0xb18   : > { %v3583_v29 = vpop.xlane.xlu0 %3582 }
 0xb19   : > { %v3590_v53 = vmul.f32 0.0078125, %v3583_v29 }
 0xb1b   : > { %v3594_v56 = vsub.f32 %v3576_v40, %v3590_v53 }
 0xb1c   : > { %v3585_v57 = vpop.xlane.xlu1 %3584 }
 0xb1d   : > { %v3591_v33 = vmul.f32 0.0078125, %v3585_v57  ;;  %v3598_v39 = vmul.f32 %v3594_v56, %v3594_v56 }
 0xb1f   : > { %v3595_v9 = vsub.f32 %v3577_v46, %v3591_v33  ;;  %3602 = vadd.xlane.f32.xlu0 %v3598_v39 }
 0xb20   : > { %v3587_v58 = vpop.xlane.xlu0 %3586 }
 0xb21   : > { %v3592_v59 = vmul.f32 0.0078125, %v3587_v58  ;;  %v3599_v60 = vmul.f32 %v3595_v9, %v3595_v9 }
 0xb23   : > { %v3596_v63 = vsub.f32 %v3578_v38, %v3592_v59  ;;  %3604 = vadd.xlane.f32.xlu1 %v3599_v60 }
 0xb24   : > { %v3589_v3 = vpop.xlane.xlu1 %3588 }
 0xb25   : > { %v3593_v12 = vmul.f32 0.0078125, %v3589_v3  ;;  %v3600_v5 = vmul.f32 %v3596_v63, %v3596_v63 }
 0xb27   : > { %v3597_v6 = vsub.f32 %v3579_v55, %v3593_v12  ;;  %3606 = vadd.xlane.f32.xlu0 %v3600_v5 }
 0xb29   : > { %v3601_v49 = vmul.f32 %v3597_v6, %v3597_v6 }
 0xb2b   : > { %3608 = vadd.xlane.f32.xlu1 %v3601_v49 }
 0xba8   : > { %v3603_v7 = vpop.xlane.xlu0 %3602 }
 0xba9   : > { %v3610_v13 = vmul.f32 0.0078125, %v3603_v7 }
 0xbab   : > { %v3614_v14 = vadd.f32 1e-05, %v3610_v13 }
 0xbac   : > { %v3605_v23 = vpop.xlane.xlu1 %3604 }
 0xbad   : > { %4697 = vrsqrt.f32 %v3614_v14  ;;  %v3611_v25 = vmul.f32 0.0078125, %v3605_v23 }
 0xbaf   : > { %v3615_v61 = vadd.f32 1e-05, %v3611_v25 }
 0xbb0   : > { %v3607_v27 = vpop.xlane.xlu0 %3606 }
 0xbb1   : > { %4699 = vrsqrt.f32 %v3615_v61  ;;  %v3612_v28 = vmul.f32 0.0078125, %v3607_v27 }
 0xbb3   : > { %v3616_v15 = vadd.f32 1e-05, %v3612_v28 }
 0xbb4   : > { %v3609_v16 = vpop.xlane.xlu1 %3608 }
 0xbb5   : > { %4701 = vrsqrt.f32 %v3616_v15  ;;  %v3613_v17 = vmul.f32 0.0078125, %v3609_v16 }
 0xbb7   : > { %v3617_v26 = vadd.f32 1e-05, %v3613_v17 }
 0xbb9   : > { %4703 = vrsqrt.f32 %v3617_v26 }
 0xbba   : > { %v4698_v18 = vpop.eup %4697 }
 0xbbb   : > { %v3622_v20 = vmul.f32 %v4698_v18, %v3594_v56 }
 0xbbd   : > { %v3632_v43 = vmul.f32 %v4080_v19, %v3622_v20 }
 0xbbe   : > { %v4700_v35 = vpop.eup %4699 }
 0xbbf   : > { %v3642_v32 = vadd.f32 %v4081_v22, %v3632_v43  ;;  %v3623_v1 = vmul.f32 %v4700_v35, %v3595_v9 }
 0xbc1   : > { %3646 = vst [vmem:[%s545_s9] sm:$0xff] %v3642_v32  ;;  %v3633_v62 = vmul.f32 %v4080_v19, %v3623_v1 }
 0xbc2   : > { %v4702_v50 = vpop.eup %4701 }
 0xbc3   : > { %v3643_v30 = vadd.f32 %v4081_v22, %v3633_v62  ;;  %v3624_v2 = vmul.f32 %v4702_v50, %v3596_v63 }
 0xbc5   : > { %3647 = vst [vmem:[%s545_s9 + $0x8] sm:$0xff] %v3643_v30  ;;  %v3634_v36 = vmul.f32 %v4080_v19, %v3624_v2 }
 0xbc6   : > { %v4704_v51 = vpop.eup %4703 }
 0xbc7   : > { %v3644_v8 = vadd.f32 %v4081_v22, %v3634_v36  ;;  %v3625_v37 = vmul.f32 %v4704_v51, %v3597_v6 }
 0xbc9   : > { %3648 = vst [vmem:[%s545_s9 + $0x10] sm:$0xff] %v3644_v8  ;;  %v3635_v11 = vmul.f32 %v4080_v19, %v3625_v37 }
 0xbcb   : > { %v3645_v40 = vadd.f32 %v4081_v22, %v3635_v11 }
 0xbcd   : > { %3649 = vst [vmem:[%s545_s9 + $0x18] sm:$0xff] %v3645_v40 }
 0xbce   : > { %4880 = shalt.err (!%p4877_p7)
}
 0xbcf   : > { %s4881_s7 = scalar_lea.hbm %s5485_s29, 512  ;;  %s4885_s23 = scalar_lea.hbm %s5588_s18, 1024 }
 0xbd0   : > { %p4882_p4 = scmp.ne.s32.totalorder %s5485_s29, %s4881_s7  ;;  %p4886_p11 = scmp.lt.s32.totalorder %s5485_s29, %s5588_s18 }
 0xbd1   : > { %p4887_p12 = scmp.lt.s32.totalorder %s4885_s23, %s4881_s7 }
 0xbd2   : > { %p4883_p8 = pnand %p4882_p4, %p5589_p3 }
 0xbd3   : > { %p4888_p0 = por %p4887_p12, %p4886_p11 }
 0xbd4   : > { %p4884_p9 = pneg %p4883_p8 }
 0xbd6   : > { %p4889_p1 = pnand %p4888_p0, %p4884_p9 }
 0xbd8   : > { %4892 = shalt.err (!%p4889_p1)
}
 0xbd9   : > { %s4977_s28 = smov 128   ;;  %s4978_s21 = smov 8  }
 0xbda   : > { %4351 = dma.vmem_to_hbm [thread:$0]  (%p5589_p3), %s5487_s16, 512, %s5485_s29, %s3651_s1, %s4977_s28, %s4977_s28, %s4978_s21  }
 0xbdb PF: > { %s3681_s14 = sand.u32 1, %s4939_s25   ;;  %p5590_p5 = scmp.ne.s32.totalorder %s5585_s3, 0 }
 0xbdc   : > { %p5591_p10 = scmp.ge.s32.totalorder %s4959_s30, 2  ;;  %s3682_s19 = scalar_lea.sflag [#allocation6], %s3681_s14 }
 0xbde   : > { %p4374_p6 = pnand %p5591_p10, %p5590_p5 }
 0xbe0   : > { %p4375_p13 = pneg %p4374_p6 }
 0xbe2   : > { %4934 = dma.done.wait (%p4375_p13), %s3682_s19, 512  }
 0xbe3   : > { %4936 = vsyncadd (%p4375_p13), %s3682_s19, 4294966784  ;;  %s32_s30 = sadd.s32 1, %s4959_s30   ;;  %s5592_s24 = sld [smem:[#allocation24_spill]] }
 0xbe4   : > { %p29_p2 = scmp.ge.s32.totalorder %s32_s30, 4   ;;  %s5593_s28 = sld [smem:[#allocation22_spill]] }
 0xbe5   : > { %s5594_s29 = sld [smem:[#allocation23_spill]]  ;;  %s5595_s25 = smov %s4943_s26 }
 0xbe6   : > { %s5596_s26 = smov %s4947_s27  ;;  %31 = sbr.rel (!%p29_p2) target bundleno = 16 (0x10), region = 142 }
 0xbe9   : > { %s5597_s27 = smov %s5592_s24 }
 0xbeb   :  { %3687 = vsyncpa [#allocation5], 1 }
 0xbec   :  { %3689 = vsyncpa [#allocation5 + $0x1], 1 }
 0xbed   :  { %3690 = vsyncpa [#allocation8], 1 }
 0xbee   :  { %3691 = vsyncpa [#allocation11], 1 }
 0xbef   :  { %3692 = vsyncpa [#allocation14], 1 }
 0xbf0   :  { %3693 = vsyncpa [#allocation6], 1 }
 0xbf1   :  { %3695 = vsyncpa [#allocation6 + $0x1], 1 }

</bundles_post_ra>
